<compile_context>
chip_gen: v7x
topology: tpu7x:2x2x1
jax: 0.10.0
libtpu: 0.0.40
codegen_flags: <defaults>
</compile_context>

<pallas_src>
import functools

import jax
import jax.numpy as jnp
import numpy as np
from jax import lax
from jax.experimental import pallas as pl
from jax.experimental.pallas import tpu as pltpu

NEG_LARGE = -1e30  # additive span-mask / padded-class value (f32-safe)


def _classifier_kernel(
    x_ref,                               # (TB*S, E)  bf16 embedded tokens (batch tile)
    e1_ref, e2_ref,                      # (TB, 2)    int32 inclusive spans
    Wenc_ref, benc_ref,                  # (E, D) bf16, (1, D) f32   seq2seq encoder
    Wagg_ref, bagg_ref,                  # (D, D) bf16, (1, D) f32   aggregate linear
    Wx_ref, Wh_ref, brnn_ref,            # (D, P), (P, P), (1, P) f32  pair tanh-RNN
    W1_ref, b1_ref,                      # (4D+P, D), (1, D) f32       linear1
    W2p_ref, b2p_ref,                    # (D, 128), (1, 128) f32      linear2 (lane-padded)
    out_ref,                             # (TB, 3*128) = [logits | probs | log_probs]
    *, TB, S,
):
    D = Wenc_ref.shape[1]
    P = Wx_ref.shape[1]

    # ---- encoder: per-timestep feedforward (bf16 operands, f32 MXU accumulate) ----
    x = x_ref[...]                                                   # (TB*S, E) bf16
    h = jnp.maximum(
        jnp.dot(x, Wenc_ref[...], preferred_element_type=jnp.float32)
        + benc_ref[...], 0.0)                                        # (TB*S, D) f32

    # ---- aggregate(cat(layer_list)) with 0 GCN layers -> single linear ----
    enc = (jnp.dot(h.astype(jnp.bfloat16), Wagg_ref[...],
                   preferred_element_type=jnp.float32)
           + bagg_ref[...])                                          # (TB*S, D) f32

    # TB*S and S are multiples of 8 -> pure sublane split (no VMEM copy).
    enc3 = enc.reshape(TB, S, D)                                     # (TB, S, D)

    # ---- span max-pooling (inclusive end): width-1 additive mask + axis-1 max ----
    pos = lax.broadcasted_iota(jnp.int32, (TB, S, 1), 1)             # sequence position

    def span_max(span_ref):
        sp = span_ref[...]                                           # (TB, 2) int32
        s = sp[:, 0:1].reshape(TB, 1, 1)
        t = sp[:, 1:2].reshape(TB, 1, 1)
        add = jnp.where((pos >= s) & (pos <= t),
                        jnp.float32(0.0), jnp.float32(NEG_LARGE))    # (TB, S, 1)
        return jnp.max(enc3 + add, axis=1)                           # (TB, D)

    e1h = span_max(e1_ref)
    e2h = span_max(e2_ref)

    # ---- pair_encoder: tanh RNN over [e1h, e2h]; keep last hidden state ----
    h0 = jnp.tanh(jnp.dot(e1h, Wx_ref[...], preferred_element_type=jnp.float32)
                  + brnn_ref[...])                                   # (TB, P)
    h1 = jnp.tanh(jnp.dot(e2h, Wx_ref[...], preferred_element_type=jnp.float32)
                  + jnp.dot(h0, Wh_ref[...], preferred_element_type=jnp.float32)
                  + brnn_ref[...])                                   # (TB, P)

    # ---- linear1 over [e1h ; e2h ; e1h*e2h ; e1h-e2h ; h1] ----
    # Five K=D dots accumulating in f32 (avoids non-128-aligned concat packing).
    out = (jnp.dot(e1h, W1_ref[0 * D:1 * D, :], preferred_element_type=jnp.float32)
           + jnp.dot(e2h, W1_ref[1 * D:2 * D, :], preferred_element_type=jnp.float32)
           + jnp.dot(e1h * e2h, W1_ref[2 * D:3 * D, :],
                     preferred_element_type=jnp.float32)
           + jnp.dot(e1h - e2h, W1_ref[3 * D:4 * D, :],
                     preferred_element_type=jnp.float32)
           + jnp.dot(h1, W1_ref[4 * D:4 * D + P, :],
                     preferred_element_type=jnp.float32)
           + b1_ref[...])                                            # (TB, D)

    # ---- linear2 (lane-padded to 128; padded lanes biased to -1e30) + softmax ----
    logits = (jnp.dot(out, W2p_ref[...], preferred_element_type=jnp.float32)
              + b2p_ref[...])                                        # (TB, 128)
    m = jnp.max(logits, axis=-1, keepdims=True)
    z = logits - m
    ez = jnp.exp(z)
    se = jnp.sum(ez, axis=-1, keepdims=True)
    probs = ez / se                        # exact: probs sum to 1, match exp(log_probs)
    logp = z - jnp.log(se)

    # 128-aligned concat of three full-lane-group slabs -> one unmasked store.
    out_ref[...] = jnp.concatenate([logits, probs, logp], axis=-1)   # (TB, 384)


def gcn_temporal_classifier_forward(tokens, e1_span, e2_span, adj, params,
                                    label=None, *, batch_tile=8):
    # ---- JAX glue: embedding lookup (gather) + text-field mask ----
    embedded = params["embedding"][tokens]            # (B, S, E) float32
    _mask = (tokens != 0)                             # get_text_field_mask; unused by
                                                      # the feedforward encoder chosen
    _ = adj                                           # adj only feeds GCN layers (0 of them)

    B, S, E = embedded.shape
    D = params["W_enc"].shape[1]
    P = params["W_rnn_x"].shape[1]
    C = params["W2"].shape[1]
    CP = 128                                          # lane-padded class width

    e1_span = e1_span.astype(jnp.int32)
    e2_span = e2_span.astype(jnp.int32)

    # Pad S to a multiple of 8 so the in-kernel reshape is a pure sublane split.
    # Padded timesteps never enter the span pool (spans stay within [0, S)).
    S_pad = (S + 7) // 8 * 8
    if S_pad != S:
        embedded = jnp.pad(embedded, ((0, 0), (0, S_pad - S), (0, 0)))

    # Pad B to a multiple of the batch tile; padded rows use the valid span [0, 0].
    TB = max(8, batch_tile)
    B_pad = pl.cdiv(B, TB) * TB
    if B_pad != B:
        pad = B_pad - B
        embedded = jnp.pad(embedded, ((0, pad), (0, 0), (0, 0)))
        e1_span = jnp.pad(e1_span, ((0, pad), (0, 0)))
        e2_span = jnp.pad(e2_span, ((0, pad), (0, 0)))

    # bf16 for the HBM-dominant operands (f32 accumulate on the MXU).
    x_flat = embedded.reshape(B_pad * S_pad, E).astype(jnp.bfloat16)
    Wenc_bf = params["W_enc"].astype(jnp.bfloat16)
    Wagg_bf = params["W_agg"].astype(jnp.bfloat16)

    # Lane-pad linear2: zero weight columns, -1e30 bias in padded class lanes so
    # the in-kernel softmax over 128 lanes ignores them.
    W2p = jnp.zeros((D, CP), jnp.float32).at[:, :C].set(params["W2"])
    b2p = jnp.full((1, CP), NEG_LARGE, jnp.float32).at[:, :C].set(params["b2"])

    weights = [Wenc_bf, params["b_enc"], Wagg_bf, params["b_agg"],
               params["W_rnn_x"], params["W_rnn_h"], params["b_rnn"],
               params["W1"], params["b1"], W2p, b2p]

    weight_bytes = sum(int(w.size) * w.dtype.itemsize for w in weights)
    cost = pl.CostEstimate(
        flops=2 * B_pad * (S_pad * E * D + S_pad * D * D
                           + 2 * D * P + P * P + (4 * D + P) * D + D * CP),
        transcendentals=B_pad * (2 * P + CP + 1),
        bytes_accessed=(int(x_flat.size) * 2 + weight_bytes
                        + 4 * B_pad * 3 * CP + 4 * 2 * B_pad * 2),
    )

    const_map = lambda i: (0, 0)
    in_specs = [
        pl.BlockSpec((TB * S_pad, E), lambda i: (i, 0)),   # x tile (pipelined)
        pl.BlockSpec((TB, 2), lambda i: (i, 0)),           # e1 spans
        pl.BlockSpec((TB, 2), lambda i: (i, 0)),           # e2 spans
    ] + [pl.BlockSpec(tuple(w.shape), const_map) for w in weights]

    fused = pl.pallas_call(
        functools.partial(_classifier_kernel, TB=TB, S=S_pad),
        out_shape=jax.ShapeDtypeStruct((B_pad, 3 * CP), jnp.float32),
        grid=(B_pad // TB,),
        in_specs=in_specs,
        out_specs=pl.BlockSpec((TB, 3 * CP), lambda i: (i, 0)),
        compiler_params=pltpu.CompilerParams(
            dimension_semantics=("parallel",),
            vmem_limit_bytes=32 * 1024 * 1024),
        cost_estimate=cost,
    )(x_flat, e1_span, e2_span, *weights)

    logits = fused[:B, 0:C]
    probs = fused[:B, CP:CP + C]
    log_probs = fused[:B, 2 * CP:2 * CP + C]

    output = {"logits": logits, "probs": probs, "log_probs": log_probs}
    if label is not None:
        # F.cross_entropy(logits, label) == -mean(log_softmax(logits)[i, label[i]])
        picked = jnp.take_along_axis(log_probs,
                                     label[:, None].astype(jnp.int32), axis=1)
        output["loss"] = -jnp.mean(picked)
    return output


def init_params(key, V, E, D, P, C):
    ks = jax.random.split(key, 8)

    def lin(k, fan_in, shape):
        return jax.random.normal(k, shape, jnp.float32) / jnp.sqrt(fan_in)

    return {
        "embedding": jax.random.normal(ks[0], (V, E), jnp.float32) * 0.1,
        "W_enc": lin(ks[1], E, (E, D)),
        "b_enc": jnp.zeros((1, D), jnp.float32),
        "W_agg": lin(ks[2], D, (D, D)),
        "b_agg": jnp.zeros((1, D), jnp.float32),
        "W_rnn_x": lin(ks[3], D, (D, P)),
        "W_rnn_h": lin(ks[4], P, (P, P)),
        "b_rnn": jnp.zeros((1, P), jnp.float32),
        "W1": lin(ks[5], 4 * D + P, (4 * D + P, D)),
        "b1": jnp.zeros((1, D), jnp.float32),
        "W2": lin(ks[6], D, (D, C)),
        "b2": jnp.zeros((1, C), jnp.float32),
    }


def _reference_logits(tokens, e1_span, e2_span, params):
    """Pure-JAX f32 reference of the same forward (for a loose sanity check)."""
    emb = params["embedding"][tokens]
    B, S, _ = emb.shape
    h = jax.nn.relu(emb @ params["W_enc"] + params["b_enc"])
    enc = h @ params["W_agg"] + params["b_agg"]
    pos = jnp.arange(S)[None, :, None]

    def span_max(sp):
        keep = (pos >= sp[:, 0, None, None]) & (pos <= sp[:, 1, None, None])
        return jnp.max(jnp.where(keep, enc, -jnp.inf), axis=1)

    e1h, e2h = span_max(e1_span), span_max(e2_span)
    h0 = jnp.tanh(e1h @ params["W_rnn_x"] + params["b_rnn"])
    h1 = jnp.tanh(e2h @ params["W_rnn_x"] + h0 @ params["W_rnn_h"] + params["b_rnn"])
    feats = jnp.concatenate([e1h, e2h, e1h * e2h, e1h - e2h, h1], axis=-1)
    out = feats @ params["W1"] + params["b1"]
    return out @ params["W2"] + params["b2"]


if __name__ == "__main__":
    B, S, E, D, P, C, V = 16, 16, 32, 32, 32, 4, 50

    key = jax.random.PRNGKey(0)
    k_tok, k_adj, k_lab, k_sp = jax.random.split(key, 4)
    tokens = jax.random.randint(k_tok, (B, S), 1, V).astype(jnp.int32)
    starts = jax.random.randint(k_sp, (B,), 0, S // 2).astype(jnp.int32)
    e1_span = jnp.stack([starts, starts + 2], axis=1)          # inclusive spans
    e2_span = jnp.stack([starts + 5, starts + 8], axis=1)
    adj = (jax.random.uniform(k_adj, (B, S, S)) > 0.7).astype(jnp.float32)
    label = jax.random.randint(k_lab, (B,), 0, C).astype(jnp.int32)

    params = init_params(jax.random.PRNGKey(42), V, E, D, P, C)

    out = gcn_temporal_classifier_forward(tokens, e1_span, e2_span, adj,
                                          params, label=label)
    jax.block_until_ready(out["logits"])
    jax.block_until_ready(out["probs"])
    jax.block_until_ready(out["log_probs"])
    jax.block_until_ready(out["loss"])

    # Loose sanity check against a pure-JAX f32 reference (kernel uses bf16 inputs
    # on the two big matmuls, so allow small absolute error).
    ref = _reference_logits(tokens, e1_span, e2_span, params)
    np.testing.assert_allclose(np.asarray(out["logits"]), np.asarray(ref),
                               rtol=0.0, atol=2e-2)
    np.testing.assert_allclose(np.asarray(out["probs"]).sum(-1),
                               np.ones((B,)), rtol=0.0, atol=1e-5)

    print("KERNEL_OK")
</pallas_src>

<mosaic_0001>
module attributes {stable_mosaic.version = 11 : i64} {
  func.func @_classifier_kernel(%arg0: i32, %arg1: memref<128x32xbf16, #tpu.memory_space<vmem>>, %arg2: memref<8x2xi32, #tpu.memory_space<vmem>>, %arg3: memref<8x2xi32, #tpu.memory_space<vmem>>, %arg4: memref<32x32xbf16, #tpu.memory_space<vmem>>, %arg5: memref<1x32xf32, #tpu.memory_space<vmem>>, %arg6: memref<32x32xbf16, #tpu.memory_space<vmem>>, %arg7: memref<1x32xf32, #tpu.memory_space<vmem>>, %arg8: memref<32x32xf32, #tpu.memory_space<vmem>>, %arg9: memref<32x32xf32, #tpu.memory_space<vmem>>, %arg10: memref<1x32xf32, #tpu.memory_space<vmem>>, %arg11: memref<160x32xf32, #tpu.memory_space<vmem>>, %arg12: memref<1x32xf32, #tpu.memory_space<vmem>>, %arg13: memref<32x128xf32, #tpu.memory_space<vmem>>, %arg14: memref<1x128xf32, #tpu.memory_space<vmem>>, %arg15: memref<8x384xf32, #tpu.memory_space<vmem>>) attributes {dimension_semantics = [#tpu.dimension_semantics<parallel>], iteration_bounds = array<i64: 2>, scalar_prefetch = 0 : i64, scratch_operands = 0 : i64, tpu.core_type = #tpu.core_type<tc>, window_params = [{transform_indices = @transform_0, window_bounds = array<i64: 128, 32>}, {transform_indices = @transform_1, window_bounds = array<i64: 8, 2>}, {transform_indices = @transform_2, window_bounds = array<i64: 8, 2>}, {pipeline_mode = #tpu.pipeline_mode<synchronous>, transform_indices = @transform_3, window_bounds = array<i64: 32, 32>}, {pipeline_mode = #tpu.pipeline_mode<synchronous>, transform_indices = @transform_4, window_bounds = array<i64: 1, 32>}, {pipeline_mode = #tpu.pipeline_mode<synchronous>, transform_indices = @transform_5, window_bounds = array<i64: 32, 32>}, {pipeline_mode = #tpu.pipeline_mode<synchronous>, transform_indices = @transform_6, window_bounds = array<i64: 1, 32>}, {pipeline_mode = #tpu.pipeline_mode<synchronous>, transform_indices = @transform_7, window_bounds = array<i64: 32, 32>}, {pipeline_mode = #tpu.pipeline_mode<synchronous>, transform_indices = @transform_8, window_bounds = array<i64: 32, 32>}, {pipeline_mode = #tpu.pipeline_mode<synchronous>, transform_indices = @transform_9, window_bounds = array<i64: 1, 32>}, {pipeline_mode = #tpu.pipeline_mode<synchronous>, transform_indices = @transform_10, window_bounds = array<i64: 160, 32>}, {pipeline_mode = #tpu.pipeline_mode<synchronous>, transform_indices = @transform_11, window_bounds = array<i64: 1, 32>}, {pipeline_mode = #tpu.pipeline_mode<synchronous>, transform_indices = @transform_12, window_bounds = array<i64: 32, 128>}, {pipeline_mode = #tpu.pipeline_mode<synchronous>, transform_indices = @transform_13, window_bounds = array<i64: 1, 128>}, {transform_indices = @transform_14, window_bounds = array<i64: 8, 384>}]} {
    %c0 = arith.constant 0 : index
    %c0_0 = arith.constant 0 : index
    %0 = vector.load %arg1[%c0, %c0_0] : memref<128x32xbf16, #tpu.memory_space<vmem>>, vector<128x32xbf16>
    %c0_1 = arith.constant 0 : index
    %c0_2 = arith.constant 0 : index
    %1 = vector.load %arg4[%c0_1, %c0_2] : memref<32x32xbf16, #tpu.memory_space<vmem>>, vector<32x32xbf16>
    %cst = arith.constant dense<0.000000e+00> : vector<128x32xf32>
    %2 = tpu.matmul %0, %1, %cst {dimension_numbers = #tpu.dot_dimension_numbers<[1], [0], [0], [1], [0, 0, 1, 1], [], []>} : vector<128x32xbf16>, vector<32x32xbf16>, vector<128x32xf32> -> vector<128x32xf32>
    %c0_3 = arith.constant 0 : index
    %c0_4 = arith.constant 0 : index
    %3 = vector.load %arg5[%c0_3, %c0_4] : memref<1x32xf32, #tpu.memory_space<vmem>>, vector<1x32xf32>
    %4 = vector.broadcast %3 : vector<1x32xf32> to vector<128x32xf32>
    %5 = arith.addf %2, %4 : vector<128x32xf32>
    %cst_5 = arith.constant 0.000000e+00 : f32
    %6 = vector.broadcast %cst_5 : f32 to vector<128x32xf32>
    %7 = arith.maximumf %5, %6 : vector<128x32xf32>
    %8 = arith.truncf %7 : vector<128x32xf32> to vector<128x32xbf16>
    %c0_6 = arith.constant 0 : index
    %c0_7 = arith.constant 0 : index
    %9 = vector.load %arg6[%c0_6, %c0_7] : memref<32x32xbf16, #tpu.memory_space<vmem>>, vector<32x32xbf16>
    %cst_8 = arith.constant dense<0.000000e+00> : vector<128x32xf32>
    %10 = tpu.matmul %8, %9, %cst_8 {dimension_numbers = #tpu.dot_dimension_numbers<[1], [0], [0], [1], [0, 0, 1, 1], [], []>} : vector<128x32xbf16>, vector<32x32xbf16>, vector<128x32xf32> -> vector<128x32xf32>
    %c0_9 = arith.constant 0 : index
    %c0_10 = arith.constant 0 : index
    %11 = vector.load %arg7[%c0_9, %c0_10] : memref<1x32xf32, #tpu.memory_space<vmem>>, vector<1x32xf32>
    %12 = vector.broadcast %11 : vector<1x32xf32> to vector<128x32xf32>
    %13 = arith.addf %10, %12 : vector<128x32xf32>
    %14 = vector.shape_cast %13 : vector<128x32xf32> to vector<8x16x32xf32>
    %15 = tpu.iota {dimensions = array<i32: 1>} : vector<8x16x1xi32>
    %c0_11 = arith.constant 0 : index
    %c0_12 = arith.constant 0 : index
    %16 = vector.load %arg2[%c0_11, %c0_12] : memref<8x2xi32, #tpu.memory_space<vmem>>, vector<8x2xi32>
    %17 = vector.extract_strided_slice %16 {offsets = [0, 0], sizes = [8, 1], strides = [1, 1]} : vector<8x2xi32> to vector<8x1xi32>
    %18 = vector.shape_cast %17 : vector<8x1xi32> to vector<8x1x1xi32>
    %19 = vector.extract_strided_slice %16 {offsets = [0, 1], sizes = [8, 1], strides = [1, 1]} : vector<8x2xi32> to vector<8x1xi32>
    %20 = vector.shape_cast %19 : vector<8x1xi32> to vector<8x1x1xi32>
    %21 = vector.broadcast %18 : vector<8x1x1xi32> to vector<8x16x1xi32>
    %22 = arith.cmpi sge, %15, %21 : vector<8x16x1xi32>
    %23 = vector.broadcast %20 : vector<8x1x1xi32> to vector<8x16x1xi32>
    %24 = arith.cmpi sle, %15, %23 : vector<8x16x1xi32>
    %25 = arith.andi %22, %24 : vector<8x16x1xi1>
    %cst_13 = arith.constant 0.000000e+00 : f32
    %cst_14 = arith.constant -1.000000e+30 : f32
    %26 = vector.broadcast %cst_13 : f32 to vector<8x16x1xf32>
    %27 = vector.broadcast %cst_14 : f32 to vector<8x16x1xf32>
    %28 = arith.select %25, %26, %27 : vector<8x16x1xi1>, vector<8x16x1xf32>
    %29 = vector.broadcast %28 : vector<8x16x1xf32> to vector<8x16x32xf32>
    %30 = arith.addf %14, %29 : vector<8x16x32xf32>
    %cst_15 = arith.constant dense<0xFF800000> : vector<8x32xf32>
    %31 = vector.multi_reduction <maximumf>, %30, %cst_15 [1] : vector<8x16x32xf32> to vector<8x32xf32>
    %c0_16 = arith.constant 0 : index
    %c0_17 = arith.constant 0 : index
    %32 = vector.load %arg3[%c0_16, %c0_17] : memref<8x2xi32, #tpu.memory_space<vmem>>, vector<8x2xi32>
    %33 = vector.extract_strided_slice %32 {offsets = [0, 0], sizes = [8, 1], strides = [1, 1]} : vector<8x2xi32> to vector<8x1xi32>
    %34 = vector.shape_cast %33 : vector<8x1xi32> to vector<8x1x1xi32>
    %35 = vector.extract_strided_slice %32 {offsets = [0, 1], sizes = [8, 1], strides = [1, 1]} : vector<8x2xi32> to vector<8x1xi32>
    %36 = vector.shape_cast %35 : vector<8x1xi32> to vector<8x1x1xi32>
    %37 = vector.broadcast %34 : vector<8x1x1xi32> to vector<8x16x1xi32>
    %38 = arith.cmpi sge, %15, %37 : vector<8x16x1xi32>
    %39 = vector.broadcast %36 : vector<8x1x1xi32> to vector<8x16x1xi32>
    %40 = arith.cmpi sle, %15, %39 : vector<8x16x1xi32>
    %41 = arith.andi %38, %40 : vector<8x16x1xi1>
    %cst_18 = arith.constant 0.000000e+00 : f32
    %cst_19 = arith.constant -1.000000e+30 : f32
    %42 = vector.broadcast %cst_18 : f32 to vector<8x16x1xf32>
    %43 = vector.broadcast %cst_19 : f32 to vector<8x16x1xf32>
    %44 = arith.select %41, %42, %43 : vector<8x16x1xi1>, vector<8x16x1xf32>
    %45 = vector.broadcast %44 : vector<8x16x1xf32> to vector<8x16x32xf32>
    %46 = arith.addf %14, %45 : vector<8x16x32xf32>
    %cst_20 = arith.constant dense<0xFF800000> : vector<8x32xf32>
    %47 = vector.multi_reduction <maximumf>, %46, %cst_20 [1] : vector<8x16x32xf32> to vector<8x32xf32>
    %c0_21 = arith.constant 0 : index
    %c0_22 = arith.constant 0 : index
    %48 = vector.load %arg8[%c0_21, %c0_22] : memref<32x32xf32, #tpu.memory_space<vmem>>, vector<32x32xf32>
    %cst_23 = arith.constant dense<0.000000e+00> : vector<8x32xf32>
    %49 = tpu.matmul %31, %48, %cst_23 {dimension_numbers = #tpu.dot_dimension_numbers<[1], [0], [0], [1], [0, 0, 1, 1], [], []>} : vector<8x32xf32>, vector<32x32xf32>, vector<8x32xf32> -> vector<8x32xf32>
    %c0_24 = arith.constant 0 : index
    %c0_25 = arith.constant 0 : index
    %50 = vector.load %arg10[%c0_24, %c0_25] : memref<1x32xf32, #tpu.memory_space<vmem>>, vector<1x32xf32>
    %51 = vector.broadcast %50 : vector<1x32xf32> to vector<8x32xf32>
    %52 = arith.addf %49, %51 : vector<8x32xf32>
    %53 = math.tanh %52 : vector<8x32xf32>
    %c0_26 = arith.constant 0 : index
    %c0_27 = arith.constant 0 : index
    %54 = vector.load %arg8[%c0_26, %c0_27] : memref<32x32xf32, #tpu.memory_space<vmem>>, vector<32x32xf32>
    %cst_28 = arith.constant dense<0.000000e+00> : vector<8x32xf32>
    %55 = tpu.matmul %47, %54, %cst_28 {dimension_numbers = #tpu.dot_dimension_numbers<[1], [0], [0], [1], [0, 0, 1, 1], [], []>} : vector<8x32xf32>, vector<32x32xf32>, vector<8x32xf32> -> vector<8x32xf32>
    %c0_29 = arith.constant 0 : index
    %c0_30 = arith.constant 0 : index
    %56 = vector.load %arg9[%c0_29, %c0_30] : memref<32x32xf32, #tpu.memory_space<vmem>>, vector<32x32xf32>
    %cst_31 = arith.constant dense<0.000000e+00> : vector<8x32xf32>
    %57 = tpu.matmul %53, %56, %cst_31 {dimension_numbers = #tpu.dot_dimension_numbers<[1], [0], [0], [1], [0, 0, 1, 1], [], []>} : vector<8x32xf32>, vector<32x32xf32>, vector<8x32xf32> -> vector<8x32xf32>
    %58 = arith.addf %55, %57 : vector<8x32xf32>
    %c0_32 = arith.constant 0 : index
    %c0_33 = arith.constant 0 : index
    %59 = vector.load %arg10[%c0_32, %c0_33] : memref<1x32xf32, #tpu.memory_space<vmem>>, vector<1x32xf32>
    %60 = vector.broadcast %59 : vector<1x32xf32> to vector<8x32xf32>
    %61 = arith.addf %58, %60 : vector<8x32xf32>
    %62 = math.tanh %61 : vector<8x32xf32>
    %c0_34 = arith.constant 0 : index
    %c0_35 = arith.constant 0 : index
    %63 = vector.load %arg11[%c0_34, %c0_35] : memref<160x32xf32, #tpu.memory_space<vmem>>, vector<32x32xf32>
    %cst_36 = arith.constant dense<0.000000e+00> : vector<8x32xf32>
    %64 = tpu.matmul %31, %63, %cst_36 {dimension_numbers = #tpu.dot_dimension_numbers<[1], [0], [0], [1], [0, 0, 1, 1], [], []>} : vector<8x32xf32>, vector<32x32xf32>, vector<8x32xf32> -> vector<8x32xf32>
    %c32 = arith.constant 32 : index
    %c0_37 = arith.constant 0 : index
    %65 = vector.load %arg11[%c32, %c0_37] : memref<160x32xf32, #tpu.memory_space<vmem>>, vector<32x32xf32>
    %cst_38 = arith.constant dense<0.000000e+00> : vector<8x32xf32>
    %66 = tpu.matmul %47, %65, %cst_38 {dimension_numbers = #tpu.dot_dimension_numbers<[1], [0], [0], [1], [0, 0, 1, 1], [], []>} : vector<8x32xf32>, vector<32x32xf32>, vector<8x32xf32> -> vector<8x32xf32>
    %67 = arith.addf %64, %66 : vector<8x32xf32>
    %68 = arith.mulf %31, %47 : vector<8x32xf32>
    %c64 = arith.constant 64 : index
    %c0_39 = arith.constant 0 : index
    %69 = vector.load %arg11[%c64, %c0_39] : memref<160x32xf32, #tpu.memory_space<vmem>>, vector<32x32xf32>
    %cst_40 = arith.constant dense<0.000000e+00> : vector<8x32xf32>
    %70 = tpu.matmul %68, %69, %cst_40 {dimension_numbers = #tpu.dot_dimension_numbers<[1], [0], [0], [1], [0, 0, 1, 1], [], []>} : vector<8x32xf32>, vector<32x32xf32>, vector<8x32xf32> -> vector<8x32xf32>
    %71 = arith.addf %67, %70 : vector<8x32xf32>
    %72 = arith.subf %31, %47 : vector<8x32xf32>
    %c96 = arith.constant 96 : index
    %c0_41 = arith.constant 0 : index
    %73 = vector.load %arg11[%c96, %c0_41] : memref<160x32xf32, #tpu.memory_space<vmem>>, vector<32x32xf32>
    %cst_42 = arith.constant dense<0.000000e+00> : vector<8x32xf32>
    %74 = tpu.matmul %72, %73, %cst_42 {dimension_numbers = #tpu.dot_dimension_numbers<[1], [0], [0], [1], [0, 0, 1, 1], [], []>} : vector<8x32xf32>, vector<32x32xf32>, vector<8x32xf32> -> vector<8x32xf32>
    %75 = arith.addf %71, %74 : vector<8x32xf32>
    %c128 = arith.constant 128 : index
    %c0_43 = arith.constant 0 : index
    %76 = vector.load %arg11[%c128, %c0_43] : memref<160x32xf32, #tpu.memory_space<vmem>>, vector<32x32xf32>
    %cst_44 = arith.constant dense<0.000000e+00> : vector<8x32xf32>
    %77 = tpu.matmul %62, %76, %cst_44 {dimension_numbers = #tpu.dot_dimension_numbers<[1], [0], [0], [1], [0, 0, 1, 1], [], []>} : vector<8x32xf32>, vector<32x32xf32>, vector<8x32xf32> -> vector<8x32xf32>
    %78 = arith.addf %75, %77 : vector<8x32xf32>
    %c0_45 = arith.constant 0 : index
    %c0_46 = arith.constant 0 : index
    %79 = vector.load %arg12[%c0_45, %c0_46] : memref<1x32xf32, #tpu.memory_space<vmem>>, vector<1x32xf32>
    %80 = vector.broadcast %79 : vector<1x32xf32> to vector<8x32xf32>
    %81 = arith.addf %78, %80 : vector<8x32xf32>
    %c0_47 = arith.constant 0 : index
    %c0_48 = arith.constant 0 : index
    %82 = vector.load %arg13[%c0_47, %c0_48] : memref<32x128xf32, #tpu.memory_space<vmem>>, vector<32x128xf32>
    %cst_49 = arith.constant dense<0.000000e+00> : vector<8x128xf32>
    %83 = tpu.matmul %81, %82, %cst_49 {dimension_numbers = #tpu.dot_dimension_numbers<[1], [0], [0], [1], [0, 0, 1, 1], [], []>} : vector<8x32xf32>, vector<32x128xf32>, vector<8x128xf32> -> vector<8x128xf32>
    %c0_50 = arith.constant 0 : index
    %c0_51 = arith.constant 0 : index
    %84 = vector.load %arg14[%c0_50, %c0_51] : memref<1x128xf32, #tpu.memory_space<vmem>>, vector<1x128xf32>
    %85 = vector.broadcast %84 : vector<1x128xf32> to vector<8x128xf32>
    %86 = arith.addf %83, %85 : vector<8x128xf32>
    %cst_52 = arith.constant dense<0xFF800000> : vector<8xf32>
    %87 = vector.multi_reduction <maximumf>, %86, %cst_52 [1] : vector<8x128xf32> to vector<8xf32>
    %88 = vector.shape_cast %87 : vector<8xf32> to vector<8x1xf32>
    %89 = vector.broadcast %88 : vector<8x1xf32> to vector<8x128xf32>
    %90 = arith.subf %86, %89 : vector<8x128xf32>
    %91 = math.exp %90 : vector<8x128xf32>
    %cst_53 = arith.constant dense<0.000000e+00> : vector<8xf32>
    %92 = vector.multi_reduction <add>, %91, %cst_53 [1] : vector<8x128xf32> to vector<8xf32>
    %93 = vector.shape_cast %92 : vector<8xf32> to vector<8x1xf32>
    %94 = vector.broadcast %93 : vector<8x1xf32> to vector<8x128xf32>
    %95 = arith.divf %91, %94 : vector<8x128xf32>
    %96 = math.log %93 : vector<8x1xf32>
    %97 = vector.broadcast %96 : vector<8x1xf32> to vector<8x128xf32>
    %98 = arith.subf %90, %97 : vector<8x128xf32>
    %99 = tpu.concatenate %86, %95, %98 in 1 : vector<8x128xf32>, vector<8x128xf32>, vector<8x128xf32> -> vector<8x384xf32>
    %c0_54 = arith.constant 0 : index
    %c0_55 = arith.constant 0 : index
    %100 = vector.load %arg15[%c0_54, %c0_55] : memref<8x384xf32, #tpu.memory_space<vmem>>, vector<8x384xf32>
    tpu.vector_store %arg15[%c0_54, %c0_55], %99 {strides = array<i32>} : memref<8x384xf32, #tpu.memory_space<vmem>>, vector<8x384xf32>,
    return
  }
  func.func @transform_0(%arg0: i32) -> (i32, i32) {
    %c0_i32 = arith.constant 0 : i32
    %c0_i32_0 = arith.constant 0 : i32
    return %arg0, %c0_i32 : i32, i32
  }
  func.func @transform_1(%arg0: i32) -> (i32, i32) {
    %c0_i32 = arith.constant 0 : i32
    %c0_i32_0 = arith.constant 0 : i32
    return %arg0, %c0_i32 : i32, i32
  }
  func.func @transform_2(%arg0: i32) -> (i32, i32) {
    %c0_i32 = arith.constant 0 : i32
    %c0_i32_0 = arith.constant 0 : i32
    return %arg0, %c0_i32 : i32, i32
  }
  func.func @transform_3(%arg0: i32) -> (i32, i32) {
    %c0_i32 = arith.constant 0 : i32
    %c0_i32_0 = arith.constant 0 : i32
    %c0_i32_1 = arith.constant 0 : i32
    return %c0_i32, %c0_i32_0 : i32, i32
  }
  func.func @transform_4(%arg0: i32) -> (i32, i32) {
    %c0_i32 = arith.constant 0 : i32
    %c0_i32_0 = arith.constant 0 : i32
    %c0_i32_1 = arith.constant 0 : i32
    return %c0_i32, %c0_i32_0 : i32, i32
  }
  func.func @transform_5(%arg0: i32) -> (i32, i32) {
    %c0_i32 = arith.constant 0 : i32
    %c0_i32_0 = arith.constant 0 : i32
    %c0_i32_1 = arith.constant 0 : i32
    return %c0_i32, %c0_i32_0 : i32, i32
  }
  func.func @transform_6(%arg0: i32) -> (i32, i32) {
    %c0_i32 = arith.constant 0 : i32
    %c0_i32_0 = arith.constant 0 : i32
    %c0_i32_1 = arith.constant 0 : i32
    return %c0_i32, %c0_i32_0 : i32, i32
  }
  func.func @transform_7(%arg0: i32) -> (i32, i32) {
    %c0_i32 = arith.constant 0 : i32
    %c0_i32_0 = arith.constant 0 : i32
    %c0_i32_1 = arith.constant 0 : i32
    return %c0_i32, %c0_i32_0 : i32, i32
  }
  func.func @transform_8(%arg0: i32) -> (i32, i32) {
    %c0_i32 = arith.constant 0 : i32
    %c0_i32_0 = arith.constant 0 : i32
    %c0_i32_1 = arith.constant 0 : i32
    return %c0_i32, %c0_i32_0 : i32, i32
  }
  func.func @transform_9(%arg0: i32) -> (i32, i32) {
    %c0_i32 = arith.constant 0 : i32
    %c0_i32_0 = arith.constant 0 : i32
    %c0_i32_1 = arith.constant 0 : i32
    return %c0_i32, %c0_i32_0 : i32, i32
  }
  func.func @transform_10(%arg0: i32) -> (i32, i32) {
    %c0_i32 = arith.constant 0 : i32
    %c0_i32_0 = arith.constant 0 : i32
    %c0_i32_1 = arith.constant 0 : i32
    return %c0_i32, %c0_i32_0 : i32, i32
  }
  func.func @transform_11(%arg0: i32) -> (i32, i32) {
    %c0_i32 = arith.constant 0 : i32
    %c0_i32_0 = arith.constant 0 : i32
    %c0_i32_1 = arith.constant 0 : i32
    return %c0_i32, %c0_i32_0 : i32, i32
  }
  func.func @transform_12(%arg0: i32) -> (i32, i32) {
    %c0_i32 = arith.constant 0 : i32
    %c0_i32_0 = arith.constant 0 : i32
    %c0_i32_1 = arith.constant 0 : i32
    return %c0_i32, %c0_i32_0 : i32, i32
  }
  func.func @transform_13(%arg0: i32) -> (i32, i32) {
    %c0_i32 = arith.constant 0 : i32
    %c0_i32_0 = arith.constant 0 : i32
    %c0_i32_1 = arith.constant 0 : i32
    return %c0_i32, %c0_i32_0 : i32, i32
  }
  func.func @transform_14(%arg0: i32) -> (i32, i32) {
    %c0_i32 = arith.constant 0 : i32
    %c0_i32_0 = arith.constant 0 : i32
    return %arg0, %c0_i32 : i32, i32
  }
}

</mosaic_0001>

<bundles_post_ra>
// kernel: tpu_custom_call.1
= control target key start
LH: loop header
LB: loop body
LE: loop exit
PB: predicated region body
PF: predicated region fallthrough
CT: control target
= control target key end

     0   :  { %s3880_s0 = inlined_call_operand.vmem [shape: bf16[256,32], index: 0, kind: input, shape index: {}]   ;;  %s3881_s1 = inlined_call_operand.vmem [shape: s32[16,2], index: 1, kind: input, shape index: {}]   ;;  %s3882_s2 = inlined_call_operand.vmem [shape: s32[16,2], index: 2, kind: input, shape index: {}]   ;;  %s3883_s3 = inlined_call_operand.vmem [shape: bf16[32,32], index: 3, kind: input, shape index: {}]   ;;  %s3884_s4 = inlined_call_operand.vmem [shape: f32[1,32], index: 4, kind: input, shape index: {}]   ;;  %s3885_s5 = inlined_call_operand.vmem [shape: bf16[32,32], index: 5, kind: input, shape index: {}]   ;;  %s3886_s6 = inlined_call_operand.vmem [shape: f32[1,32], index: 6, kind: input, shape index: {}]   ;;  %s3887_s7 = inlined_call_operand.vmem [shape: f32[32,32], index: 7, kind: input, shape index: {}]   ;;  %s3888_s8 = inlined_call_operand.vmem [shape: f32[32,32], index: 8, kind: input, shape index: {}]   ;;  %s3889_s9 = inlined_call_operand.vmem [shape: f32[1,32], index: 9, kind: input, shape index: {}]   ;;  %s3890_s10 = inlined_call_operand.vmem [shape: f32[160,32], index: 10, kind: input, shape index: {}]   ;;  %s3891_s11 = inlined_call_operand.vmem [shape: f32[1,32], index: 11, kind: input, shape index: {}]   ;;  %s3892_s12 = inlined_call_operand.vmem [shape: f32[32,128], index: 12, kind: input, shape index: {}]   ;;  %s3893_s13 = inlined_call_operand.vmem [shape: f32[1,128], index: 13, kind: input, shape index: {}]   ;;  %s3894_s14 = inlined_call_operand.hbm [shape: f32[16,384], index: 14, kind: output, shape index: {}]  }
   0x1   :  { %3896 = sst [smem:[#allocation7_spill]] %s3880_s0 }
   0x2   :  { %3897 = sst [smem:[#allocation8_spill]] %s3883_s3 }
   0x3   :  { %19 = vsyncpa [#allocation3], 0 }
   0x4   :  { %21 = vsyncpa [#allocation3 + $0x1], 0  ;;  %s3066_s29 = smov 0   ;;  %s3068_s30 = smov 0  }
   0x5   :  { %s3070_s15 = smov 0   ;;  %s3072_s16 = smov 0  }
   0x6 LB: > { %3898 = sst [smem:[#allocation5_spill]] %s2977_s15  ;;  %s3087_s17 = sadd.s32 4294967295, %s2981_s16   ;;  %s2981_s16 = sphi %s3072_s16, %s3908_s16   ;;  %s2977_s15 = sphi %s3070_s15, %s3905_s15   ;;  %s2973_s30 = sphi %s3068_s30, %s3907_s30   ;;  %s2969_s29 = sphi %s3066_s29, %s3906_s29  }
   0x7   : > { %s2534_s18 = sadd.s32 4294967294, %s2981_s16   ;;  %s3091_s19 = sadd.s32 1, %s2981_s16  }
   0x8   : > { %s343_s20 = sadd.s32 1, %s2977_s15  ;;  %s340_s21 = ssub.s32 %s2981_s16, %s3091_s19 }
   0x9   : > { %p353_p0 = scmp.ne.s32.totalorder %s2977_s15, %s2973_s30  ;;  %p341_p1 = scmp.eq.s32.totalorder %s340_s21, 0 }
   0xa   : > { %p354_p2 = scmp.eq.s32.totalorder %s3087_s17, 1  ;;  %p359_p3 = scmp.ne.s32.totalorder %s2973_s30, %s2969_s29 }
   0xb   : > { %p360_p4 = scmp.eq.s32.totalorder %s2534_s18, 1  ;;  %p2537_p7 = scmp.ge.s32.totalorder %s2981_s16, 1 }
   0xc   : > { %s3102_s22 = scalar_select %p341_p1, %s2977_s15, %s343_s20  }
   0xd   : > { %p3104_p5 = por %p354_p2, %p353_p0  ;;  %p3108_p6 = por %p360_p4, %p359_p3 }
   0xe   : > { %3899 = sst [smem:[#allocation6_spill]] %s3102_s22  ;;  %p434_p8 = scmp.lt.s32.totalorder %s2981_s16, 3 }
  0x10   : > { %p435_p9 = pnand %p2537_p7, %p434_p8 }
  0x11   : > { %s3902_s3 = sld [smem:[#allocation8_spill]] (!%p435_p9)  ;;  %s2538_s27 = sshll.u32 (!%p435_p9), %s3087_s17, 4  ;;  %v872_v1 = vlaneseq (!%p435_p9)  ;;  %v2983_v4 = vmov (!%p435_p9), 1966171168   ;;  %v2984_v6 = vmov (!%p435_p9), 0   ;;  %vm582_vm0 = vcmask (!%p435_p9), 261120  }
  0x12   : > { %438 = sbr.rel (%p435_p9) target bundleno = 1741 (0x6cd), region = 76  ;;  %p489_p10 = scmp.lt.s32.totalorder (!%p435_p9), %s2538_s27, 31  ;;  %v878_v5 = vunpack.c.l.s4 (!%p435_p9), %v2983_v4  ;;  %2893 = vset.pattern.permute.xlu0 (!%p435_p9), %v2984_v6  ;;  %2894 = vset.pattern.permute.xlu1 (!%p435_p9), %v2984_v6 }
  0x13   : > { %p494_p11 = scmp.lt.s32.totalorder (!%p435_p9), %s3087_s17, 1  ;;  %v3122_v3 = vshrl.u32 (!%p435_p9), %v872_v1, 7  ;;  %s3903_s0 = sld [smem:[#allocation7_spill]] (!%p435_p9) }
  0x14   : > { %v879_v7 = vunpack.c.0.s8 (!%p435_p9), %v878_v5 }
  0x15   : > { %v3149_v13 = vsub.s32 (!%p435_p9), 0, %v3122_v3  ;;  %v3155_v18 = vadd.s32 (!%p435_p9), 8, %v3122_v3 }
  0x16   : > { %v3142_v9 = vsub.s32 (!%p435_p9), %v879_v7, %v3122_v3 }
  0x17   : > { %v2895_v0 = vld [vmem:[%s3902_s3] sm:$0xff] (!%p435_p9)   ;;  %v2896_v2 = vld [vmem:[%s3902_s3 + $0x8] sm:$0xff] (!%p435_p9)   ;;  %s2985_s3 = smov (!%p435_p9), 127  }
  0x18   : > { %2652 = vmatprep.subr.bf16.mxu0 (!%p435_p9), %v2895_v0 }
  0x19   : > { %2653 = vmatpush3.bf16.msra.mxu0 %v2895_v0  ;;  %s3910_s27 = smov (!%p489_p10, %s2538_s27), 31 }
  0x1a   : > { %2654 = vmatprep.subr.bf16.mxu0 %v2896_v2  ;;  %s3126_s20 = scalar_select %p494_p11, %s3087_s17, 1 }
  0x1b   : > { %s2539_s21 = sshll.u32 %s3910_s27, 2 }
  0x1c   : > { %s3132_s28 = scalar_lea.vmem %s3903_s0, %s2539_s21  ;;  %s2540_s18 = sshll.u32 %s3126_s20, 3 }
  0x1d   : > { %2655 = vmatpush3.bf16.msra.mxu0 %v2896_v2  ;;  %v2897_v8 = vld [vmem:[%s3132_s28] sm:$0xff]   ;;  %s497_s15 = scalar_lea.vmem %s3881_s1, %s2540_s18  ;;  %v2898_v10 = vld [vmem:[%s3132_s28 + $0x8] sm:$0xff]   ;;  %v2900_v15 = vld [vmem:[%s3132_s28 + $0x10] sm:$0xff]   ;;  %s501_s27 = scalar_lea.vmem %s3882_s2, %s2540_s18 }
  0x1e   : > { %2656 = vmatprep.mubr.msk.bf16.mxu0 %vm582_vm0, %v2897_v8  ;;  %v875_v11 = vld [vmem:[%s497_s15] sm:$0xff]  ;;  %v2901_v22 = vld [vmem:[%s3132_s28 + $0x18] sm:$0xff]   ;;  %v2903_v32 = vld [vmem:[%s3132_s28 + $0x28] sm:$0xff]   ;;  %s2846_s21 = smul.u32 384, %s3087_s17  ;;  %s2990_s17 = smov [#allocation2]  }
  0x1f   : > { %v883_v12 = vrot.slane %v875_v11, %v3142_v9  ;;  %v876_v14 = vcombine.high %v875_v11, %v875_v11  ;;  %v2902_v24 = vld [vmem:[%s3132_s28 + $0x20] sm:$0xff]   ;;  %v2904_v37 = vld [vmem:[%s3132_s28 + $0x30] sm:$0xff]   ;;  %v2905_v43 = vld [vmem:[%s3132_s28 + $0x38] sm:$0xff]  }
  0x20   : > { %2657 = vmatmul.mubr.msk.bf16.vlgmr.msra.gmra.mrb[0].mxu0 %vm582_vm0, %v2898_v10  ;;  %v1253_v55 = vld [vmem:[%s501_s27] sm:$0xff]  ;;  %s3838_s18 = scalar_lea.hbm %s3894_s14, %s2846_s21  ;;  %s2923_s27 = sshll.u32 %s2990_s17, 4  ;;  %s2924_s27 = int_to_ptr.vmem [resolvable:$false] %s2923_s27 }
  0x21   : > { %v899_v16 = vrot.slane %v883_v12, %v3142_v9  ;;  %v891_v17 = vcombine.high %v883_v12, %v883_v12  ;;  %2660 = vmatprep.mubr.msk.bf16.mxu0 %vm582_vm0, %v2900_v15  ;;  %v890_v19 = vrot.slane %v876_v14, %v3142_v9  ;;  %v1261_v56 = vrot.slane %v1253_v55, %v3142_v9  ;;  %s2925_s0 = scalar_lea.vmem %s2924_s27, 768 }
  0x22   : > { %v1254_v5 = vcombine.high %v1253_v55, %v1253_v55 }
  0x23   : > { %v3159_v20 = vrot.slane %v899_v16, %v3149_v13  ;;  %v913_v21 = vrot.slane %v891_v17, %v3142_v9  ;;  %v921_v23 = vcombine.high %v899_v16, %v899_v16  ;;  %v906_v27 = vrot.slane %v890_v19, %v3142_v9 }
  0x24   : > { %v892_v35 = vcombine.high %v890_v19, %v890_v19  ;;  %v1277_v58 = vrot.slane %v1261_v56, %v3142_v9  ;;  %v1269_v59 = vcombine.high %v1261_v56, %v1261_v56  ;;  %v1268_v7 = vrot.slane %v1254_v5, %v3142_v9 }
  0x25   : > { %vm973_vm1 = vcmp.le.s32.totalorder %v3122_v3, %v3159_v20  ;;  %v3167_v25 = vrot.slane %v913_v21, %v3149_v13  ;;  %vm974_vm2 = vcmp.le.s32.totalorder %v3155_v18, %v3159_v20  ;;  %v3180_v28 = vrot.slane %v921_v23, %v3149_v13 }
  0x26   : > { %v989_v26 = vsel %vm973_vm1, 1, %v2984_v6  ;;  %v990_v30 = vsel %vm974_vm2, 1, %v2984_v6  ;;  %v3194_v33 = vrot.slane %v906_v27, %v3149_v13  ;;  %v923_v34 = vcombine.high %v913_v21, %v913_v21  ;;  %v2907_v21 = vld [vmem:[%s3885_s5] sm:$0xff]  }
  0x27   : > { %1005 = vrot.lane.b32.xlu0 %v989_v26, %s2985_s3  ;;  %vm975_vm3 = vcmp.le.s32.totalorder %v3122_v3, %v3167_v25  ;;  %vm976_vm4 = vcmp.le.s32.totalorder %v3155_v18, %v3167_v25  ;;  %vm977_vm5 = vcmp.le.s32.totalorder %v3122_v3, %v3180_v28  ;;  %vm978_vm6 = vcmp.le.s32.totalorder %v3155_v18, %v3180_v28 }
  0x28   : > { %2661 = vmatmul.mubr.msk.bf16.gmra.mrb[4].mxu0 %vm582_vm0, %v2901_v22  ;;  %v991_v29 = vsel %vm975_vm3, 1, %v2984_v6  ;;  %v992_v31 = vsel %vm976_vm4, 1, %v2984_v6  ;;  %v993_v36 = vsel %vm977_vm5, 1, %v2984_v6  ;;  %vm981_vm7 = vcmp.le.s32.totalorder %v3122_v3, %v3194_v33  ;;  %2672 = vmatprep.subr.bf16.mxu1 %v2907_v21 }
  0x29   : > { %2664 = vmatprep.mubr.msk.bf16.mxu0 %vm582_vm0, %v2902_v24  ;;  %1009 = vrot.lane.b32.xlu1 %v991_v29, %s2985_s3  ;;  %v994_v38 = vsel %vm978_vm6, 1, %v2984_v6  ;;  %vm982_vm8 = vcmp.le.s32.totalorder %v3155_v18, %v3194_v33  ;;  %v3207_v39 = vrot.slane %v923_v34, %v3149_v13  ;;  %v920_v40 = vrot.slane %v892_v35, %v3142_v9 }
  0x2a   : > { %v997_v41 = vsel %vm981_vm7, 1, %v2984_v6  ;;  %v998_v42 = vsel %vm982_vm8, 1, %v2984_v6  ;;  %v922_v45 = vcombine.high %v906_v27, %v906_v27  ;;  %v3266_v61 = vrot.slane %v1277_v58, %v3149_v13  ;;  %2673 = vmatpush3.bf16.msra.mxu1 %v2907_v21 }
  0x2b   : > { %1007 = vrot.lane.b32.xlu0 %v990_v30, %s2985_s3  ;;  %vm979_vm9 = vcmp.le.s32.totalorder %v3122_v3, %v3207_v39  ;;  %vm980_vm10 = vcmp.le.s32.totalorder %v3155_v18, %v3207_v39  ;;  %v3221_v44 = vrot.slane %v920_v40, %v3149_v13  ;;  %v924_v49 = vcombine.high %v920_v40, %v920_v40 }
  0x2c   : > { %v995_v46 = vsel %vm979_vm9, 1, %v2984_v6  ;;  %v996_v47 = vsel %vm980_vm10, 1, %v2984_v6  ;;  %v3233_v48 = vrot.slane %v922_v45, %v3149_v13  ;;  %v1291_v62 = vrot.slane %v1269_v59, %v3142_v9 }
  0x2d   : > { %1011 = vrot.lane.b32.xlu1 %v992_v31, %s2985_s3  ;;  %vm983_vm11 = vcmp.le.s32.totalorder %v3122_v3, %v3221_v44  ;;  %vm984_vm12 = vcmp.le.s32.totalorder %v3155_v18, %v3221_v44  ;;  %v3244_v52 = vrot.slane %v924_v49, %v3149_v13  ;;  %v1299_v0 = vcombine.high %v1277_v58, %v1277_v58 }
  0x2e   : > { %v999_v50 = vsel %vm983_vm11, 1, %v2984_v6  ;;  %vm985_vm13 = vcmp.le.s32.totalorder %v3122_v3, %v3233_v48  ;;  %v1000_v51 = vsel %vm984_vm12, 1, %v2984_v6  ;;  %vm986_vm14 = vcmp.le.s32.totalorder %v3155_v18, %v3233_v48 }
  0x2f   : > { %1013 = vrot.lane.b32.xlu0 %v993_v36, %s2985_s3  ;;  %v1001_v53 = vsel %vm985_vm13, 1, %v2984_v6  ;;  %vm987_vm15 = vcmp.le.s32.totalorder %v3122_v3, %v3244_v52  ;;  %v1002_v54 = vsel %vm986_vm14, 1, %v2984_v6  ;;  %vm988_vm1 = vcmp.le.s32.totalorder %v3155_v18, %v3244_v52 }
  0x30   : > { %2665 = vmatmul.mubr.msk.bf16.gmra.mrb[8].mxu0 %vm582_vm0, %v2903_v32  ;;  %v1003_v57 = vsel %vm987_vm15, 1, %v2984_v6  ;;  %v1004_v60 = vsel %vm988_vm1, 1, %v2984_v6  ;;  %v3271_v63 = vrot.slane %v1291_v62, %v3149_v13  ;;  %v3274_v1 = vrot.slane %v1299_v0, %v3149_v13 }
  0x31   : > { %2668 = vmatprep.mubr.msk.bf16.mxu0 %vm582_vm0, %v2904_v37  ;;  %1015 = vrot.lane.b32.xlu1 %v994_v38, %s2985_s3  ;;  %v1301_v2 = vcombine.high %v1291_v62, %v1291_v62  ;;  %v1284_v8 = vrot.slane %v1268_v7, %v3142_v9  ;;  %v1270_v10 = vcombine.high %v1268_v7, %v1268_v7  ;;  %v2986_v23 = vmov -1e+30  }
  0x32   : > { %vm957_vm2 = vcmp.ge.s32.totalorder %v3122_v3, %v3159_v20  ;;  %vm959_vm5 = vcmp.ge.s32.totalorder %v3122_v3, %v3167_v25  ;;  %vm958_vm7 = vcmp.ge.s32.totalorder %v3155_v18, %v3159_v20  ;;  %vm960_vm10 = vcmp.ge.s32.totalorder %v3155_v18, %v3167_v25 }
  0x33   : > { %1021 = vrot.lane.b32.xlu0 %v997_v41, %s2985_s3  ;;  %v3277_v4 = vrot.slane %v1301_v2, %v3149_v13  ;;  %v3282_v11 = vrot.slane %v1284_v8, %v3149_v13  ;;  %v1298_v12 = vrot.slane %v1270_v10, %v3142_v9  ;;  %v1300_v15 = vcombine.high %v1284_v8, %v1284_v8  ;;  %v2908_v9 = vld [vmem:[%s3885_s5 + $0x8] sm:$0xff]  }
  0x34   : > { %2674 = vmatprep.subr.bf16.mxu1 %v2908_v9  ;;  %vm961_vm13 = vcmp.ge.s32.totalorder %v3122_v3, %v3180_v28  ;;  %vm962_vm15 = vcmp.ge.s32.totalorder %v3155_v18, %v3180_v28 }
  0x35   : > { %1023 = vrot.lane.b32.xlu1 %v998_v42, %s2985_s3  ;;  %v3286_v14 = vrot.slane %v1298_v12, %v3149_v13  ;;  %v3289_v16 = vrot.slane %v1300_v15, %v3149_v13  ;;  %v1302_v17 = vcombine.high %v1298_v12, %v1298_v12  ;;  %2675 = vmatpush3.bf16.msra.mxu1 %v2908_v9  ;;  %v2542_v15 = vld [vmem:[%s3884_s4] ss:$0 sm:$0xff] }
  0x37   : > { %1017 = vrot.lane.b32.xlu0 %v995_v46, %s2985_s3  ;;  %v3292_v19 = vrot.slane %v1302_v17, %v3149_v13 }
  0x38   : > { %2669 = vmatmul.mubr.msk.bf16.gmra.mrb[12].mxu0 %vm582_vm0, %v2905_v43 }
  0x39   : > { %1019 = vrot.lane.b32.xlu1 %v996_v47, %s2985_s3 }
  0x3b   : > { %1025 = vrot.lane.b32.xlu0 %v999_v50, %s2985_s3 }
  0x3d   : > { %1027 = vrot.lane.b32.xlu1 %v1000_v51, %s2985_s3 }
  0x3f   : > { %1029 = vrot.lane.b32.xlu0 %v1001_v53, %s2985_s3 }
  0x41   : > { %1031 = vrot.lane.b32.xlu1 %v1002_v54, %s2985_s3 }
  0x43   : > { %1033 = vrot.lane.b32.xlu0 %v1003_v57, %s2985_s3 }
  0x45   : > { %1035 = vrot.lane.b32.xlu1 %v1004_v60, %s2985_s3 }
  0x99   : > { %v1006_v22 = vpop.permute.xlu0 %1005 }
  0x9a   : > { %vm1037_vm3 = vcmp.ne.s32.totalorder %v1006_v22, 0 }
  0x9b   : > { %vm1053_vm4 = vmand %vm957_vm2, %vm1037_vm3  ;;  %v1010_v13 = vpop.permute.xlu1 %1009 }
  0x9c   : > { %vm1039_vm6 = vcmp.ne.s32.totalorder %v1010_v13, 0  ;;  %v1069_v24 = vsel %vm1053_vm4, 0.0, %v2986_v23  ;;  %vm965_vm4 = vcmp.ge.s32.totalorder %v3122_v3, %v3194_v33 }
  0x9d   : > { %v1008_v26 = vpop.permute.xlu0 %1007  ;;  %1087 = vperm.xlu0 %2893, %v1069_v24   ;;  %vm1055_vm8 = vmand %vm959_vm5, %vm1039_vm6  ;;  %vm966_vm6 = vcmp.ge.s32.totalorder %v3155_v18, %v3194_v33 }
  0x9e   : > { %vm1038_vm9 = vcmp.ne.s32.totalorder %v1008_v26, 0  ;;  %v1071_v31 = vsel %vm1055_vm8, 0.0, %v2986_v23 }
  0x9f   : > { %vm1054_vm11 = vmand %vm958_vm7, %vm1038_vm9  ;;  %v1012_v27 = vpop.permute.xlu1 %1011 }
  0xa0   : > { %vm1040_vm12 = vcmp.ne.s32.totalorder %v1012_v27, 0  ;;  %v1070_v29 = vsel %vm1054_vm11, 0.0, %v2986_v23 }
  0xa1   : > { %vm1056_vm14 = vmand %vm960_vm10, %vm1040_vm12  ;;  %1092 = vperm.xlu1 %2894, %v1070_v29   ;;  %v1014_v20 = vpop.permute.xlu0 %1013  ;;  %vm963_vm10 = vcmp.ge.s32.totalorder %v3122_v3, %v3207_v39  ;;  %vm964_vm12 = vcmp.ge.s32.totalorder %v3155_v18, %v3207_v39 }
  0xa2   : > { %v1072_v30 = vsel %vm1056_vm14, 0.0, %v2986_v23  ;;  %vm1041_vm1 = vcmp.ne.s32.totalorder %v1014_v20, 0 }
  0xa3   : > { %v1016_v25 = vpop.permute.xlu1 %1015  ;;  %1102 = vperm.xlu0 %2893, %v1072_v30   ;;  %vm1057_vm2 = vmand %vm961_vm13, %vm1041_vm1  ;;  %vm967_vm1 = vcmp.ge.s32.totalorder %v3122_v3, %v3221_v44 }
  0xa4   : > { %vm1042_vm3 = vcmp.ne.s32.totalorder %v1016_v25, 0  ;;  %v1073_v34 = vsel %vm1057_vm2, 0.0, %v2986_v23 }
  0xa5   : > { %vm1058_vm5 = vmand %vm962_vm15, %vm1042_vm3  ;;  %1097 = vperm.xlu1 %2894, %v1071_v31   ;;  %v1022_v32 = vpop.permute.xlu0 %1021  ;;  %vm968_vm3 = vcmp.ge.s32.totalorder %v3155_v18, %v3221_v44 }
  0xa6   : > { %v1074_v28 = vsel %vm1058_vm5, 0.0, %v2986_v23  ;;  %vm1045_vm7 = vcmp.ne.s32.totalorder %v1022_v32, 0 }
  0xa7   : > { %v1024_v35 = vpop.permute.xlu1 %1023  ;;  %1112 = vperm.xlu0 %2893, %v1074_v28   ;;  %vm1061_vm8 = vmand %vm965_vm4, %vm1045_vm7  ;;  %vm969_vm7 = vcmp.ge.s32.totalorder %v3122_v3, %v3233_v48 }
  0xa8   : > { %vm1046_vm9 = vcmp.ne.s32.totalorder %v1024_v35, 0  ;;  %v1077_v37 = vsel %vm1061_vm8, 0.0, %v2986_v23 }
  0xa9   : > { %vm1062_vm11 = vmand %vm966_vm6, %vm1046_vm9  ;;  %1107 = vperm.xlu1 %2894, %v1073_v34   ;;  %v1018_v36 = vpop.permute.xlu0 %1017  ;;  %vm970_vm9 = vcmp.ge.s32.totalorder %v3155_v18, %v3233_v48 }
  0xaa   : > { %v1078_v33 = vsel %vm1062_vm11, 0.0, %v2986_v23  ;;  %vm1043_vm13 = vcmp.ne.s32.totalorder %v1018_v36, 0 }
  0xab   : > { %v1020_v38 = vpop.permute.xlu1 %1019  ;;  %1132 = vperm.xlu0 %2893, %v1078_v33   ;;  %vm1059_vm14 = vmand %vm963_vm10, %vm1043_vm13  ;;  %vm971_vm13 = vcmp.ge.s32.totalorder %v3122_v3, %v3244_v52 }
  0xac   : > { %vm1044_vm15 = vcmp.ne.s32.totalorder %v1020_v38, 0  ;;  %v1075_v41 = vsel %vm1059_vm14, 0.0, %v2986_v23 }
  0xad   : > { %vm1060_vm2 = vmand %vm964_vm12, %vm1044_vm15  ;;  %1127 = vperm.xlu1 %2894, %v1077_v37   ;;  %v1026_v40 = vpop.permute.xlu0 %1025  ;;  %vm972_vm15 = vcmp.ge.s32.totalorder %v3155_v18, %v3244_v52 }
  0xae   : > { %v1076_v39 = vsel %vm1060_vm2, 0.0, %v2986_v23  ;;  %vm1047_vm4 = vcmp.ne.s32.totalorder %v1026_v40, 0 }
  0xaf   : > { %v1028_v42 = vpop.permute.xlu1 %1027  ;;  %1122 = vperm.xlu0 %2893, %v1076_v39   ;;  %vm1063_vm5 = vmand %vm967_vm1, %vm1047_vm4 }
  0xb0   : > { %vm1048_vm6 = vcmp.ne.s32.totalorder %v1028_v42, 0  ;;  %v1079_v45 = vsel %vm1063_vm5, 0.0, %v2986_v23  ;;  %vm1352_vm5 = vcmp.le.s32.totalorder %v3155_v18, %v3266_v61 }
  0xb1   : > { %vm1064_vm8 = vmand %vm968_vm3, %vm1048_vm6  ;;  %1117 = vperm.xlu1 %2894, %v1075_v41   ;;  %v1030_v43 = vpop.permute.xlu0 %1029  ;;  %vm1351_vm6 = vcmp.le.s32.totalorder %v3122_v3, %v3266_v61  ;;  %v1368_v52 = vsel %vm1352_vm5, 1, %v2984_v6  ;;  %vm1365_vm5 = vcmp.le.s32.totalorder %v3122_v3, %v3292_v19 }
  0xb2   : > { %v1080_v44 = vsel %vm1064_vm8, 0.0, %v2986_v23  ;;  %vm1049_vm10 = vcmp.ne.s32.totalorder %v1030_v43, 0  ;;  %v1367_v54 = vsel %vm1351_vm6, 1, %v2984_v6  ;;  %vm1353_vm8 = vcmp.le.s32.totalorder %v3122_v3, %v3271_v63 }
  0xb3   : > { %v1032_v46 = vpop.permute.xlu1 %1031  ;;  %1142 = vperm.xlu0 %2893, %v1080_v44   ;;  %vm1065_vm11 = vmand %vm969_vm7, %vm1049_vm10  ;;  %vm1354_vm7 = vcmp.le.s32.totalorder %v3155_v18, %v3271_v63  ;;  %v1369_v56 = vsel %vm1353_vm8, 1, %v2984_v6  ;;  %vm1355_vm10 = vcmp.le.s32.totalorder %v3122_v3, %v3274_v1  ;;  %v1381_v12 = vsel %vm1365_vm5, 1, %v2984_v6 }
  0xb4   : > { %vm1050_vm12 = vcmp.ne.s32.totalorder %v1032_v46, 0  ;;  %v1081_v49 = vsel %vm1065_vm11, 0.0, %v2986_v23  ;;  %v1370_v55 = vsel %vm1354_vm7, 1, %v2984_v6  ;;  %vm1358_vm11 = vcmp.le.s32.totalorder %v3155_v18, %v3277_v4 }
  0xb5   : > { %vm1066_vm14 = vmand %vm970_vm9, %vm1050_vm12  ;;  %1137 = vperm.xlu1 %2894, %v1079_v45   ;;  %v1034_v47 = vpop.permute.xlu0 %1033  ;;  %vm1356_vm9 = vcmp.le.s32.totalorder %v3155_v18, %v3274_v1  ;;  %v1371_v58 = vsel %vm1355_vm10, 1, %v2984_v6  ;;  %vm1357_vm12 = vcmp.le.s32.totalorder %v3122_v3, %v3277_v4  ;;  %v1374_v59 = vsel %vm1358_vm11, 1, %v2984_v6 }
  0xb6   : > { %v1082_v48 = vsel %vm1066_vm14, 0.0, %v2986_v23  ;;  %vm1051_vm1 = vcmp.ne.s32.totalorder %v1034_v47, 0  ;;  %v1372_v57 = vsel %vm1356_vm9, 1, %v2984_v6  ;;  %v1373_v60 = vsel %vm1357_vm12, 1, %v2984_v6 }
  0xb7   : > { %v1036_v50 = vpop.permute.xlu1 %1035  ;;  %1152 = vperm.xlu0 %2893, %v1082_v48   ;;  %vm1067_vm2 = vmand %vm971_vm13, %vm1051_vm1  ;;  %vm1360_vm13 = vcmp.le.s32.totalorder %v3155_v18, %v3282_v11  ;;  %vm1359_vm14 = vcmp.le.s32.totalorder %v3122_v3, %v3282_v11  ;;  %vm1361_vm1 = vcmp.le.s32.totalorder %v3122_v3, %v3286_v14  ;;  %vm1336_vm6 = vcmp.ge.s32.totalorder %v3155_v18, %v3266_v61 }
  0xb8   : > { %vm1052_vm3 = vcmp.ne.s32.totalorder %v1036_v50, 0  ;;  %v1083_v53 = vsel %vm1067_vm2, 0.0, %v2986_v23  ;;  %v1376_v62 = vsel %vm1360_vm13, 1, %v2984_v6  ;;  %v1375_v0 = vsel %vm1359_vm14, 1, %v2984_v6 }
  0xb9   : > { %vm1068_vm4 = vmand %vm972_vm15, %vm1052_vm3  ;;  %1147 = vperm.xlu1 %2894, %v1081_v49   ;;  %vm1362_vm15 = vcmp.le.s32.totalorder %v3155_v18, %v3286_v14  ;;  %vm1364_vm2 = vcmp.le.s32.totalorder %v3155_v18, %v3289_v16  ;;  %v1377_v5 = vsel %vm1361_vm1, 1, %v2984_v6  ;;  %vm1363_vm3 = vcmp.le.s32.totalorder %v3122_v3, %v3289_v16 }
  0xba   : > { %v1084_v51 = vsel %vm1068_vm4, 0.0, %v2986_v23  ;;  %v1378_v2 = vsel %vm1362_vm15, 1, %v2984_v6  ;;  %v1380_v7 = vsel %vm1364_vm2, 1, %v2984_v6  ;;  %vm1366_vm4 = vcmp.le.s32.totalorder %v3155_v18, %v3292_v19 }
  0xbb   : > { %1162 = vperm.xlu0 %2893, %v1084_v51   ;;  %v1379_v8 = vsel %vm1363_vm3, 1, %v2984_v6  ;;  %v1382_v10 = vsel %vm1366_vm4, 1, %v2984_v6  ;;  %vm1335_vm8 = vcmp.ge.s32.totalorder %v3122_v3, %v3266_v61  ;;  %vm1338_vm11 = vcmp.ge.s32.totalorder %v3155_v18, %v3271_v63 }
  0xbc   : > { %vm1337_vm14 = vcmp.ge.s32.totalorder %v3122_v3, %v3271_v63  ;;  %vm1340_vm2 = vcmp.ge.s32.totalorder %v3155_v18, %v3274_v1  ;;  %vm1339_vm5 = vcmp.ge.s32.totalorder %v3122_v3, %v3274_v1 }
  0xbd   : > { %1157 = vperm.xlu1 %2894, %v1083_v53  }
  0xbf   : > { %1385 = vrot.lane.b32.xlu0 %v1368_v52, %s2985_s3 }
  0xc1   : > { %1383 = vrot.lane.b32.xlu1 %v1367_v54, %s2985_s3 }
  0xc3   : > { %1389 = vrot.lane.b32.xlu0 %v1370_v55, %s2985_s3 }
  0xc5   : > { %1387 = vrot.lane.b32.xlu1 %v1369_v56, %s2985_s3 }
  0xc7   : > { %1393 = vrot.lane.b32.xlu0 %v1372_v57, %s2985_s3 }
  0xc9   : > { %1391 = vrot.lane.b32.xlu1 %v1371_v58, %s2985_s3 }
  0xcb   : > { %1397 = vrot.lane.b32.xlu0 %v1374_v59, %s2985_s3 }
  0xcd   : > { %1395 = vrot.lane.b32.xlu1 %v1373_v60, %s2985_s3 }
  0xcf   : > { %1401 = vrot.lane.b32.xlu0 %v1376_v62, %s2985_s3 }
  0xd1   : > { %1399 = vrot.lane.b32.xlu1 %v1375_v0, %s2985_s3 }
  0xd3   : > { %1405 = vrot.lane.b32.xlu0 %v1378_v2, %s2985_s3 }
  0xd5   : > { %1403 = vrot.lane.b32.xlu1 %v1377_v5, %s2985_s3 }
  0xd7   : > { %1409 = vrot.lane.b32.xlu0 %v1380_v7, %s2985_s3 }
  0xd9   : > { %1407 = vrot.lane.b32.xlu1 %v1379_v8, %s2985_s3 }
  0xdb   : > { %1413 = vrot.lane.b32.xlu0 %v1382_v10, %s2985_s3 }
  0xdd   : > { %1411 = vrot.lane.b32.xlu1 %v1381_v12, %s2985_s3  ;;  %s485_s3 = sand.u32 1, %s2973_s30  }
  0xde   : > { %s2845_s15 = smul.u32 24, %s485_s3 }
  0xe0   : > { %s487_s20 = scalar_lea.vmem [#allocation2], %s2845_s15  ;;  %s2437_s15 = scalar_lea.sflag [#allocation3], %s485_s3 }
  0xe1   : > { %s2451_s25 = sshll.u32 %s487_s20, 4  ;;  %s3840_s25 = int_to_ptr.vmem [resolvable:$true] %s2451_s25 }
  0xe2   : > { %s2919_s22 = scalar_lea.vmem %s3840_s25, 384  ;;  %p2926_p1 = scmp.lt.s32.totalorder %s3840_s25, %s2924_s27 }
  0xe3   : > { %p2920_p12 = scmp.ne.s32.totalorder %s3840_s25, %s2919_s22  ;;  %p2927_p2 = scmp.lt.s32.totalorder %s2925_s0, %s2919_s22 }
  0xe5   : > { %p2921_p13 = pnand %p2920_p12, %p3104_p5  ;;  %p2928_p3 = por %p2927_p2, %p2926_p1 }
  0xe7   : > { %p2922_p0 = pneg %p2921_p13 }
  0xe9   : > { %p2929_p4 = pnand %p2928_p3, %p2922_p0 }
  0xf3   : > { %v2658_v17 = vpop.f32.mrb[0].mxu0 }
  0xf4   : > { %v650_v21 = vadd.f32 %v2658_v17, %v2542_v15  ;;  %v641_v9 = vpop.f32.mrb[1].mxu0 }
  0xf5   : > { %v642_v22 = vadd.f32 %v2542_v15, %v641_v9  ;;  %v2659_v13 = vpop.f32.mrb[2].mxu0 }
  0xf6   : > { %v653_v24 = vadd.f32 %v2659_v13, %v2542_v15  ;;  %v644_v26 = vpop.f32.mrb[3].mxu0  ;;  %v706_v29 = vmax.f32 %v650_v21, 0.0 }
  0xf7   : > { %v645_v27 = vadd.f32 %v2542_v15, %v644_v26  ;;  %v704_v30 = vmax.f32 %v642_v22, 0.0 }
  0xf8   : > { %v707_v20 = vmax.f32 %v653_v24, 0.0 }
  0xf9   : > { %v705_v6 = vmax.f32 %v645_v27, 0.0 }
  0xfa   : > { %v721_v31 = vpack.c.bf16 %v707_v20, %v706_v29 }
  0xfb   : > { %v2662_v25 = vpop.f32.mrb[4].mxu0  ;;  %v720_v32 = vpack.c.bf16 %v705_v6, %v704_v30 }
  0xfc   : > { %v666_v28 = vadd.f32 %v2662_v25, %v2542_v15  ;;  %v657_v34 = vpop.f32.mrb[5].mxu0 }
  0xfd   : > { %v658_v35 = vadd.f32 %v2542_v15, %v657_v34  ;;  %v2663_v36 = vpop.f32.mrb[6].mxu0  ;;  %2676 = vmatprep.mubr.msk.bf16.mxu1 %vm582_vm0, %v720_v32 }
  0xfe   : > { %v669_v33 = vadd.f32 %v2663_v36, %v2542_v15  ;;  %v660_v37 = vpop.f32.mrb[7].mxu0  ;;  %2677 = vmatmul.mubr.msk.bf16.vlgmr.msra.gmra.mrb[0].mxu1 %vm582_vm0, %v721_v31  ;;  %v710_v40 = vmax.f32 %v666_v28, 0.0 }
  0xff   : > { %v661_v38 = vadd.f32 %v2542_v15, %v660_v37  ;;  %v708_v41 = vmax.f32 %v658_v35, 0.0 }
 0x100   : > { %v711_v39 = vmax.f32 %v669_v33, 0.0 }
 0x101   : > { %v709_v42 = vmax.f32 %v661_v38, 0.0 }
 0x102   : > { %v723_v43 = vpack.c.bf16 %v711_v39, %v710_v40 }
 0x103   : > { %v722_v44 = vpack.c.bf16 %v709_v42, %v708_v41  ;;  %v2666_v45 = vpop.f32.mrb[8].mxu0 }
 0x104   : > { %v682_v46 = vadd.f32 %v2666_v45, %v2542_v15  ;;  %v673_v47 = vpop.f32.mrb[9].mxu0 }
 0x105   : > { %v674_v48 = vadd.f32 %v2542_v15, %v673_v47  ;;  %v2667_v49 = vpop.f32.mrb[10].mxu0  ;;  %2680 = vmatprep.mubr.msk.bf16.mxu1 %vm582_vm0, %v722_v44 }
 0x106   : > { %v685_v50 = vadd.f32 %v2667_v49, %v2542_v15  ;;  %v676_v51 = vpop.f32.mrb[11].mxu0  ;;  %2681 = vmatmul.mubr.msk.bf16.gmra.mrb[4].mxu1 %vm582_vm0, %v723_v43  ;;  %v714_v52 = vmax.f32 %v682_v46, 0.0 }
 0x107   : > { %v677_v53 = vadd.f32 %v2542_v15, %v676_v51  ;;  %v712_v55 = vmax.f32 %v674_v48, 0.0 }
 0x108   : > { %v715_v54 = vmax.f32 %v685_v50, 0.0 }
 0x109   : > { %v713_v56 = vmax.f32 %v677_v53, 0.0 }
 0x10a   : > { %v725_v57 = vpack.c.bf16 %v715_v54, %v714_v52 }
 0x10b   : > { %v724_v58 = vpack.c.bf16 %v713_v56, %v712_v55  ;;  %v2670_v59 = vpop.f32.mrb[12].mxu0 }
 0x10c   : > { %v698_v60 = vadd.f32 %v2670_v59, %v2542_v15  ;;  %v689_v62 = vpop.f32.mrb[13].mxu0 }
 0x10d   : > { %v690_v0 = vadd.f32 %v2542_v15, %v689_v62  ;;  %v2671_v2 = vpop.f32.mrb[14].mxu0  ;;  %2684 = vmatprep.mubr.msk.bf16.mxu1 %vm582_vm0, %v724_v58  ;;  %v1632_v62 = vld [vmem:[%s3887_s7 + $0x8] sm:$0xff] }
 0x10e   : > { %v701_v5 = vadd.f32 %v2671_v2, %v2542_v15  ;;  %v692_v7 = vpop.f32.mrb[15].mxu0  ;;  %2685 = vmatmul.mubr.msk.bf16.gmra.mrb[8].mxu1 %vm582_vm0, %v725_v57  ;;  %v718_v10 = vmax.f32 %v698_v60, 0.0 }
 0x10f   : > { %v693_v8 = vadd.f32 %v2542_v15, %v692_v7  ;;  %v716_v17 = vmax.f32 %v690_v0, 0.0  ;;  %v1634_v0 = vld [vmem:[%s3887_s7 + $0x18] sm:$0xff]  ;;  %v1737_v7 = vld [vmem:[%s3888_s8] sm:$0xff] }
 0x110   : > { %v719_v12 = vmax.f32 %v701_v5, 0.0  ;;  %v2989_v5 = vmov 0.0  }
 0x111   : > { %v717_v21 = vmax.f32 %v693_v8, 0.0  ;;  %v1738_v8 = vld [vmem:[%s3888_s8 + $0x8] sm:$0xff] }
 0x112   : > { %v727_v9 = vpack.c.bf16 %v719_v12, %v718_v10  ;;  %v1739_v10 = vld [vmem:[%s3888_s8 + $0x10] sm:$0xff]  ;;  %v2798_v12 = vpack.c.bf16 %v1738_v8, %v1737_v7 }
 0x113   : > { %v726_v22 = vpack.c.bf16 %v717_v21, %v716_v17  ;;  %v1740_v17 = vld [vmem:[%s3888_s8 + $0x18] sm:$0xff] }
 0x114   : > { %v2801_v21 = vpack.c.bf16 %v1740_v17, %v1739_v10 }
 0x115   : > { %2688 = vmatprep.mubr.msk.bf16.mxu1 %vm582_vm0, %v726_v22 }
 0x116   : > { %2689 = vmatmul.mubr.msk.bf16.gmra.mrb[12].mxu1 %vm582_vm0, %v727_v9 }
 0x11c   : > { %v3423_v13 = vpop.permute.xlu0 %1087 }
 0x120   : > { %v3425_v24 = vpop.permute.xlu1 %1092 }
 0x122   : > { %v3427_v26 = vpop.permute.xlu0 %1102 }
 0x124   : > { %v3429_v27 = vpop.permute.xlu1 %1097 }
 0x126   : > { %v3431_v29 = vpop.permute.xlu0 %1112 }
 0x128   : > { %v3433_v15 = vpop.permute.xlu1 %1107 }
 0x12a   : > { %v3435_v20 = vpop.permute.xlu0 %1132 }
 0x12c   : > { %v3437_v30 = vpop.permute.xlu1 %1127 }
 0x12e   : > { %v3439_v6 = vpop.permute.xlu0 %1122 }
 0x130   : > { %v3441_v31 = vpop.permute.xlu1 %1117 }
 0x132   : > { %v3443_v25 = vpop.permute.xlu0 %1142 }
 0x134   : > { %v3445_v32 = vpop.permute.xlu1 %1137 }
 0x136   : > { %v3447_v28 = vpop.permute.xlu0 %1152 }
 0x138   : > { %v3449_v34 = vpop.permute.xlu1 %1147 }
 0x13a   : > { %v3451_v35 = vpop.permute.xlu0 %1162 }
 0x13c   : > { %v3453_v36 = vpop.permute.xlu1 %1157 }
 0x13e   : > { %v1386_v33 = vpop.permute.xlu0 %1385 }
 0x13f   : > { %vm1416_vm7 = vcmp.ne.s32.totalorder %v1386_v33, 0 }
 0x140   : > { %vm1432_vm9 = vmand %vm1336_vm6, %vm1416_vm7  ;;  %v1384_v37 = vpop.permute.xlu1 %1383 }
 0x141   : > { %vm1415_vm10 = vcmp.ne.s32.totalorder %v1384_v37, 0  ;;  %v1448_v38 = vsel %vm1432_vm9, 0.0, %v2986_v23  ;;  %v3546_v37 = vld [vmem:[%s3886_s6] ss:$0 sm:$0xff] }
 0x142   : > { %vm1431_vm12 = vmand %vm1335_vm8, %vm1415_vm10  ;;  %1470 = vperm.xlu0 %2893, %v1448_v38   ;;  %v1390_v40 = vpop.permute.xlu0 %1389  ;;  %vm1342_vm8 = vcmp.ge.s32.totalorder %v3155_v18, %v3277_v4 }
 0x143   : > { %vm1418_vm13 = vcmp.ne.s32.totalorder %v1390_v40, 0  ;;  %v1447_v39 = vsel %vm1431_vm12, 0.0, %v2986_v23 }
 0x144   : > { %vm1434_vm15 = vmand %vm1338_vm11, %vm1418_vm13  ;;  %1465 = vperm.xlu1 %2894, %v1447_v39   ;;  %v1388_v61 = vpop.permute.xlu1 %1387  ;;  %vm1341_vm11 = vcmp.ge.s32.totalorder %v3122_v3, %v3277_v4 }
 0x145   : > { %vm1417_vm1 = vcmp.ne.s32.totalorder %v1388_v61, 0  ;;  %v1450_v41 = vsel %vm1434_vm15, 0.0, %v2986_v23 }
 0x146   : > { %vm1433_vm3 = vmand %vm1337_vm14, %vm1417_vm1  ;;  %1480 = vperm.xlu0 %2893, %v1450_v41   ;;  %v1394_v42 = vpop.permute.xlu0 %1393  ;;  %vm1344_vm14 = vcmp.ge.s32.totalorder %v3155_v18, %v3282_v11 }
 0x147   : > { %vm1420_vm4 = vcmp.ne.s32.totalorder %v1394_v42, 0  ;;  %v1449_v43 = vsel %vm1433_vm3, 0.0, %v2986_v23 }
 0x148   : > { %vm1436_vm6 = vmand %vm1340_vm2, %vm1420_vm4  ;;  %1475 = vperm.xlu1 %2894, %v1449_v43   ;;  %v1392_v63 = vpop.permute.xlu1 %1391  ;;  %vm1343_vm2 = vcmp.ge.s32.totalorder %v3122_v3, %v3282_v11 }
 0x149   : > { %vm1419_vm7 = vcmp.ne.s32.totalorder %v1392_v63, 0  ;;  %v1452_v44 = vsel %vm1436_vm6, 0.0, %v2986_v23 }
 0x14a   : > { %vm1435_vm9 = vmand %vm1339_vm5, %vm1419_vm7  ;;  %1490 = vperm.xlu0 %2893, %v1452_v44   ;;  %v1398_v45 = vpop.permute.xlu0 %1397  ;;  %vm1346_vm5 = vcmp.ge.s32.totalorder %v3155_v18, %v3286_v14 }
 0x14b   : > { %vm1422_vm10 = vcmp.ne.s32.totalorder %v1398_v45, 0  ;;  %v1451_v46 = vsel %vm1435_vm9, 0.0, %v2986_v23 }
 0x14c   : > { %vm1438_vm12 = vmand %vm1342_vm8, %vm1422_vm10  ;;  %1485 = vperm.xlu1 %2894, %v1451_v46   ;;  %v1396_v1 = vpop.permute.xlu1 %1395  ;;  %vm1345_vm8 = vcmp.ge.s32.totalorder %v3122_v3, %v3286_v14 }
 0x14d   : > { %vm1421_vm13 = vcmp.ne.s32.totalorder %v1396_v1, 0  ;;  %v1454_v47 = vsel %vm1438_vm12, 0.0, %v2986_v23 }
 0x14e   : > { %vm1437_vm15 = vmand %vm1341_vm11, %vm1421_vm13  ;;  %1500 = vperm.xlu0 %2893, %v1454_v47   ;;  %v1402_v48 = vpop.permute.xlu0 %1401  ;;  %vm1348_vm11 = vcmp.ge.s32.totalorder %v3155_v18, %v3289_v16 }
 0x14f   : > { %vm1424_vm1 = vcmp.ne.s32.totalorder %v1402_v48, 0  ;;  %v1453_v49 = vsel %vm1437_vm15, 0.0, %v2986_v23 }
 0x150   : > { %vm1440_vm3 = vmand %vm1344_vm14, %vm1424_vm1  ;;  %1495 = vperm.xlu1 %2894, %v1453_v49   ;;  %v1400_v4 = vpop.permute.xlu1 %1399  ;;  %vm1347_vm14 = vcmp.ge.s32.totalorder %v3122_v3, %v3289_v16 }
 0x151   : > { %vm1423_vm4 = vcmp.ne.s32.totalorder %v1400_v4, 0  ;;  %v1456_v50 = vsel %vm1440_vm3, 0.0, %v2986_v23 }
 0x152   : > { %vm1439_vm6 = vmand %vm1343_vm2, %vm1423_vm4  ;;  %1510 = vperm.xlu0 %2893, %v1456_v50   ;;  %v1406_v51 = vpop.permute.xlu0 %1405  ;;  %vm1350_vm2 = vcmp.ge.s32.totalorder %v3155_v18, %v3292_v19  ;;  %v1631_v18 = vld [vmem:[%s3887_s7] sm:$0xff] }
 0x153   : > { %vm1426_vm7 = vcmp.ne.s32.totalorder %v1406_v51, 0  ;;  %v1455_v53 = vsel %vm1439_vm6, 0.0, %v2986_v23 }
 0x154   : > { %vm1442_vm9 = vmand %vm1346_vm5, %vm1426_vm7  ;;  %1505 = vperm.xlu1 %2894, %v1455_v53   ;;  %v1404_v11 = vpop.permute.xlu1 %1403  ;;  %vm1349_vm5 = vcmp.ge.s32.totalorder %v3122_v3, %v3292_v19  ;;  %v2987_v3 = vmov 0.0|0.0   ;;  %v3510_v19 = vpack.c.bf16 %v1632_v62, %v1631_v18 }
 0x155   : > { %vm1425_vm10 = vcmp.ne.s32.totalorder %v1404_v11, 0  ;;  %v1458_v52 = vsel %vm1442_vm9, 0.0, %v2986_v23  ;;  %2791 = vmatprep.subr.bf16.mxu0 %v2987_v3  ;;  %2797 = vmatprep.subr.bf16.mxu1 %v2987_v3  ;;  %vm2988_vm9 = vmmov 0  }
 0x156   : > { %vm1441_vm12 = vmand %vm1345_vm8, %vm1425_vm10  ;;  %1520 = vperm.xlu0 %2893, %v1458_v52   ;;  %v1410_v54 = vpop.permute.xlu0 %1409  ;;  %2793 = vmatpush3.bf16.msra.mxu0 %v3510_v19  ;;  %vm1650_vm10 = vcmask 1041409  }
 0x157   : > { %vm1428_vm13 = vcmp.ne.s32.totalorder %v1410_v54, 0  ;;  %v1457_v55 = vsel %vm1441_vm12, 0.0, %v2986_v23  ;;  %2794 = vmatprep.subr.bf16.mxu0 %v2987_v3  ;;  %2700 = vmatprep.mubr.msk.f32.mxu0 %vm2988_vm9, %v2989_v5  ;;  %vm1654_vm12 = vcmask 1043459  }
 0x158   : > { %vm1444_vm15 = vmand %vm1348_vm11, %vm1428_vm13  ;;  %1515 = vperm.xlu1 %2894, %v1457_v55   ;;  %v1408_v14 = vpop.permute.xlu1 %1407  ;;  %2711 = vmatprep.mubr.msk.f32.mxu1 %vm2988_vm9, %v2989_v5  ;;  %vm1652_vm11 = vcmask 1042434   ;;  %vm1656_vm13 = vcmask 1044484  }
 0x159   : > { %vm1427_vm1 = vcmp.ne.s32.totalorder %v1408_v14, 0  ;;  %v1460_v56 = vsel %vm1444_vm15, 0.0, %v2986_v23  ;;  %2799 = vmatpush3.bf16.msra.mxu1 %v2798_v12  ;;  %vm1660_vm15 = vcmask 1046534  }
 0x15a   : > { %vm1443_vm3 = vmand %vm1347_vm14, %vm1427_vm1  ;;  %1530 = vperm.xlu0 %2893, %v1460_v56   ;;  %v1414_v57 = vpop.permute.xlu0 %1413  ;;  %2800 = vmatprep.subr.bf16.mxu1 %v2987_v3  ;;  %vm1658_vm14 = vcmask 1045509   ;;  %vm1662_vm1 = vcmask 1047559  }
 0x15b   : > { %vm1430_vm4 = vcmp.ne.s32.totalorder %v1414_v57, 0  ;;  %v1459_v58 = vsel %vm1443_vm3, 0.0, %v2986_v23 }
 0x15c   : > { %vm1446_vm6 = vmand %vm1350_vm2, %vm1430_vm4  ;;  %1525 = vperm.xlu1 %2894, %v1459_v58   ;;  %v1412_v16 = vpop.permute.xlu1 %1411 }
 0x15d   : > { %vm1429_vm7 = vcmp.ne.s32.totalorder %v1412_v16, 0  ;;  %v1462_v59 = vsel %vm1446_vm6, 0.0, %v2986_v23  ;;  %2802 = vmatpush3.bf16.msra.mxu1 %v2801_v21 }
 0x15e   : > { %vm1445_vm8 = vmand %vm1349_vm5, %vm1429_vm7  ;;  %1540 = vperm.xlu0 %2893, %v1462_v59   ;;  %2809 = vmatprep.subr.bf16.mxu1 %v2987_v3 }
 0x15f   : > { %v1461_v60 = vsel %vm1445_vm8, 0.0, %v2986_v23  ;;  %v1633_v23 = vld [vmem:[%s3887_s7 + $0x10] sm:$0xff] }
 0x160   : > { %1535 = vperm.xlu1 %2894, %v1461_v60   ;;  %v3521_v2 = vpack.c.bf16 %v1634_v0, %v1633_v23 }
 0x162   : > { %2796 = vmatpush3.bf16.msra.mxu0 %v3521_v2 }
 0x163   : > { %2803 = vmatprep.subr.bf16.mxu0 %v2987_v3 }
 0x1c1   : > { %v1471_v22 = vpop.permute.xlu0 %1470 }
 0x1c3   : > { %v1466_v9 = vpop.permute.xlu1 %1465 }
 0x1c5   : > { %v1481_v42 = vpop.permute.xlu0 %1480 }
 0x1c7   : > { %v1476_v33 = vpop.permute.xlu1 %1475 }
 0x1c9   : > { %v1491_v58 = vpop.permute.xlu0 %1490 }
 0x1cb   : > { %v1486_v46 = vpop.permute.xlu1 %1485 }
 0x1cf   : > { %v1496_v18 = vpop.permute.xlu1 %1495 }
 0x1d1   : > { %v2678_v38 = vpop.f32.mrb[0].mxu1 }
 0x1d2   : > { %v818_v40 = vadd.f32 %v2678_v38, %v3546_v37  ;;  %v809_v39 = vpop.f32.mrb[1].mxu1 }
 0x1d3   : > { %v810_v61 = vadd.f32 %v3546_v37, %v809_v39  ;;  %v2679_v41 = vpop.f32.mrb[2].mxu1 }
 0x1d4   : > { %v1167_v43 = vadd.f32 %v3429_v27, %v818_v40  ;;  %v1545_v63 = vadd.f32 %v1476_v33, %v818_v40  ;;  %v821_v44 = vadd.f32 %v2679_v41, %v3546_v37  ;;  %v812_v45 = vpop.f32.mrb[3].mxu1 }
 0x1d5   : > { %v1165_v1 = vadd.f32 %v3423_v13, %v810_v61  ;;  %v1543_v47 = vadd.f32 %v1466_v9, %v810_v61  ;;  %v813_v48 = vadd.f32 %v3546_v37, %v812_v45 }
 0x1d6   : > { %v1168_v49 = vadd.f32 %v3427_v26, %v821_v44  ;;  %v1546_v4 = vadd.f32 %v1481_v42, %v821_v44  ;;  %v1190_v50 = vsel %vm582_vm0, %v1167_v43, -inf  ;;  %v1568_v51 = vsel %vm582_vm0, %v1545_v63, -inf }
 0x1d7   : > { %v1166_v53 = vadd.f32 %v3425_v24, %v813_v48  ;;  %v1544_v27 = vadd.f32 %v1471_v22, %v813_v48  ;;  %v1181_v11 = vsel %vm582_vm0, %v1165_v1, -inf  ;;  %v1559_v52 = vsel %vm582_vm0, %v1543_v47, -inf  ;;  %v1501_v1 = vpop.permute.xlu0 %1500 }
 0x1d8   : > { %v1191_v54 = vsel %vm582_vm0, %v1168_v49, -inf  ;;  %v1569_v13 = vsel %vm582_vm0, %v1546_v4, -inf }
 0x1d9   : > { %v1192_v55 = vmax.f32 %v1190_v50, %v1191_v54  ;;  %v1570_v14 = vmax.f32 %v1568_v51, %v1569_v13  ;;  %v1182_v26 = vsel %vm582_vm0, %v1166_v53, -inf  ;;  %v1560_v56 = vsel %vm582_vm0, %v1544_v27, -inf  ;;  %v2682_v57 = vpop.f32.mrb[4].mxu1 }
 0x1da   : > { %v1183_v16 = vmax.f32 %v1181_v11, %v1182_v26  ;;  %v1561_v59 = vmax.f32 %v1559_v52, %v1560_v56  ;;  %v834_v24 = vadd.f32 %v2682_v57, %v3546_v37  ;;  %v825_v60 = vpop.f32.mrb[5].mxu1 }
 0x1db   : > { %v1193_v62 = vrot.slane %v1192_v55, 4  ;;  %v1571_v23 = vrot.slane %v1570_v14, 4  ;;  %v826_v0 = vadd.f32 %v3546_v37, %v825_v60  ;;  %v2683_v7 = vpop.f32.mrb[6].mxu1 }
 0x1dc   : > { %v1184_v8 = vrot.slane %v1183_v16, 4  ;;  %v1562_v10 = vrot.slane %v1561_v59, 4  ;;  %v1171_v12 = vadd.f32 %v3441_v31, %v834_v24  ;;  %v1549_v17 = vadd.f32 %v1496_v18, %v834_v24  ;;  %v828_v21 = vpop.f32.mrb[7].mxu1 }
 0x1dd   : > { %v1194_v9 = vmax.f32 %v1192_v55, %v1193_v62  ;;  %v1572_v22 = vmax.f32 %v1570_v14, %v1571_v23  ;;  %v1169_v33 = vadd.f32 %v3433_v15, %v826_v0  ;;  %v1547_v38 = vadd.f32 %v1486_v46, %v826_v0 }
 0x1de   : > { %v1185_v40 = vmax.f32 %v1183_v16, %v1184_v8  ;;  %v1563_v39 = vmax.f32 %v1561_v59, %v1562_v10  ;;  %v1208_v42 = vsel %vm582_vm0, %v1171_v12, -inf  ;;  %v1586_v43 = vsel %vm582_vm0, %v1549_v17, -inf  ;;  %v1506_v59 = vpop.permute.xlu1 %1505 }
 0x1df   : > { %v1195_v61 = vrot.slane %v1194_v9, 2  ;;  %v1573_v41 = vrot.slane %v1572_v22, 2  ;;  %v837_v31 = vadd.f32 %v2683_v7, %v3546_v37  ;;  %v829_v45 = vadd.f32 %v3546_v37, %v828_v21 }
 0x1e0   : > { %v1186_v63 = vrot.slane %v1185_v40, 2  ;;  %v1564_v44 = vrot.slane %v1563_v39, 2  ;;  %v1199_v15 = vsel %vm582_vm0, %v1169_v33, -inf  ;;  %v1577_v46 = vsel %vm582_vm0, %v1547_v38, -inf }
 0x1e1   : > { %v1196_v47 = vmax.f32 %v1194_v9, %v1195_v61  ;;  %v1574_v48 = vmax.f32 %v1572_v22, %v1573_v41  ;;  %v2686_v49 = vpop.f32.mrb[8].mxu1  ;;  %v1172_v51 = vadd.f32 %v3439_v6, %v837_v31  ;;  %v1550_v53 = vadd.f32 %v1501_v1, %v837_v31  ;;  %v1511_v22 = vpop.permute.xlu0 %1510 }
 0x1e2   : > { %v1187_v4 = vmax.f32 %v1185_v40, %v1186_v63  ;;  %v1565_v50 = vmax.f32 %v1563_v39, %v1564_v44  ;;  %v841_v27 = vpop.f32.mrb[9].mxu1  ;;  %v1170_v54 = vadd.f32 %v3431_v29, %v829_v45  ;;  %v1548_v13 = vadd.f32 %v1491_v58, %v829_v45  ;;  %v1516_v31 = vpop.permute.xlu1 %1515 }
 0x1e3   : > { %v1197_v11 = vrot.slane %v1196_v47, 1  ;;  %v1575_v52 = vrot.slane %v1574_v48, 1  ;;  %v2687_v55 = vpop.f32.mrb[10].mxu1  ;;  %v1209_v56 = vsel %vm582_vm0, %v1172_v51, -inf  ;;  %v1587_v57 = vsel %vm582_vm0, %v1550_v53, -inf }
 0x1e4   : > { %v1188_v14 = vrot.slane %v1187_v4, 1  ;;  %v1566_v26 = vrot.slane %v1565_v50, 1  ;;  %v844_v16 = vpop.f32.mrb[11].mxu1  ;;  %v1210_v6 = vmax.f32 %v1208_v42, %v1209_v56  ;;  %v1588_v18 = vmax.f32 %v1586_v43, %v1587_v57 }
 0x1e5   : > { %v3578_v24 = vmax.f32 %v1196_v47, %v1197_v11  ;;  %v3580_v60 = vmax.f32 %v1574_v48, %v1575_v52  ;;  %v1200_v29 = vsel %vm582_vm0, %v1170_v54, -inf  ;;  %v1578_v58 = vsel %vm582_vm0, %v1548_v13, -inf }
 0x1e6   : > { %v3582_v62 = vmax.f32 %v1187_v4, %v1188_v14  ;;  %v3584_v23 = vmax.f32 %v1565_v50, %v1566_v26  ;;  %v1211_v8 = vrot.slane %v1210_v6, 4  ;;  %v1589_v10 = vrot.slane %v1588_v18, 4  ;;  %v1521_v26 = vpop.permute.xlu0 %1520 }
 0x1e7   : > { %v3590_v0 = vmul.f32 %v3580_v60, %v3578_v24  ;;  %v2152_v7 = vsub.f32 %v3578_v24, %v3580_v60  ;;  %v1201_v40 = vmax.f32 %v1199_v15, %v1200_v29  ;;  %v1579_v39 = vmax.f32 %v1577_v46, %v1578_v58 }
 0x1e8   : > { %v3597_v12 = vsel %vm1650_vm10, %v3578_v24, %v3582_v62  ;;  %v3602_v17 = vsel %vm1650_vm10, %v3580_v60, %v3584_v23  ;;  %v3606_v21 = vmul.f32 %v3584_v23, %v3582_v62  ;;  %v2151_v9 = vsub.f32 %v3582_v62, %v3584_v23 }
 0x1e9   : > { %v1212_v33 = vmax.f32 %v1210_v6, %v1211_v8  ;;  %v1590_v38 = vmax.f32 %v1588_v18, %v1589_v10  ;;  %v2690_v61 = vpop.f32.mrb[12].mxu1  ;;  %v850_v41 = vadd.f32 %v2686_v49, %v3546_v37  ;;  %v842_v42 = vadd.f32 %v3546_v37, %v841_v27 }
 0x1ea   : > { %v853_v43 = vadd.f32 %v2687_v55, %v3546_v37  ;;  %v845_v63 = vadd.f32 %v3546_v37, %v844_v16  ;;  %v857_v44 = vpop.f32.mrb[13].mxu1  ;;  %v1202_v47 = vrot.slane %v1201_v40, 4  ;;  %v1580_v48 = vrot.slane %v1579_v39, 4 }
 0x1eb   : > { %v1213_v45 = vrot.slane %v1212_v33, 2  ;;  %v1591_v1 = vrot.slane %v1590_v38, 2  ;;  %v3614_v4 = vpop.f32.mrb[14].mxu1  ;;  %v1175_v15 = vadd.f32 %v3445_v32, %v850_v41  ;;  %v1553_v46 = vadd.f32 %v1516_v31, %v850_v41 }
 0x1ec   : > { %v1173_v49 = vadd.f32 %v3437_v30, %v842_v42  ;;  %v1551_v50 = vadd.f32 %v1506_v59, %v842_v42  ;;  %v3618_v51 = vpop.f32.mrb[15].mxu1  ;;  %v1203_v11 = vmax.f32 %v1201_v40, %v1202_v47  ;;  %v1581_v52 = vmax.f32 %v1579_v39, %v1580_v48 }
 0x1ed   : > { %v1214_v53 = vmax.f32 %v1212_v33, %v1213_v45  ;;  %v1592_v27 = vmax.f32 %v1590_v38, %v1591_v1  ;;  %v1226_v54 = vsel %vm582_vm0, %v1175_v15, -inf  ;;  %v1604_v13 = vsel %vm582_vm0, %v1553_v46, -inf  ;;  %v1526_v33 = vpop.permute.xlu1 %1525 }
 0x1ee   : > { %v1217_v55 = vsel %vm582_vm0, %v1173_v49, -inf  ;;  %v1595_v14 = vsel %vm582_vm0, %v1551_v50, -inf  ;;  %v1204_v57 = vrot.slane %v1203_v11, 2  ;;  %v1582_v30 = vrot.slane %v1581_v52, 2 }
 0x1ef   : > { %v1215_v32 = vrot.slane %v1214_v53, 1  ;;  %v1593_v56 = vrot.slane %v1592_v27, 1  ;;  %v1176_v16 = vadd.f32 %v3443_v25, %v853_v43  ;;  %v1554_v59 = vadd.f32 %v1521_v26, %v853_v43 }
 0x1f0   : > { %v1174_v6 = vadd.f32 %v3435_v20, %v845_v63  ;;  %v1552_v18 = vadd.f32 %v1511_v22, %v845_v63  ;;  %v1205_v8 = vmax.f32 %v1203_v11, %v1204_v57  ;;  %v1583_v10 = vmax.f32 %v1581_v52, %v1582_v30 }
 0x1f1   : > { %v3626_v29 = vmax.f32 %v1214_v53, %v1215_v32  ;;  %v3628_v58 = vmax.f32 %v1592_v27, %v1593_v56  ;;  %v1227_v38 = vsel %vm582_vm0, %v1176_v16, -inf  ;;  %v1605_v40 = vsel %vm582_vm0, %v1554_v59, -inf }
 0x1f2   : > { %v1218_v39 = vsel %vm582_vm0, %v1174_v6, -inf  ;;  %v1596_v41 = vsel %vm582_vm0, %v1552_v18, -inf  ;;  %v1206_v22 = vrot.slane %v1205_v8, 1  ;;  %v1584_v42 = vrot.slane %v1583_v10, 1 }
 0x1f3   : > { %v3636_v20 = vmul.f32 %v3628_v58, %v3626_v29  ;;  %v2154_v25 = vsub.f32 %v3626_v29, %v3628_v58  ;;  %v1228_v43 = vmax.f32 %v1226_v54, %v1227_v38  ;;  %v1606_v63 = vmax.f32 %v1604_v13, %v1605_v40  ;;  %v1536_v54 = vpop.permute.xlu1 %1535 }
 0x1f4   : > { %v1219_v31 = vmax.f32 %v1217_v55, %v1218_v39  ;;  %v1597_v45 = vmax.f32 %v1595_v14, %v1596_v41  ;;  %v3640_v1 = vmax.f32 %v1205_v8, %v1206_v22  ;;  %v3642_v47 = vmax.f32 %v1583_v10, %v1584_v42 }
 0x1f5   : > { %v866_v48 = vadd.f32 %v2690_v61, %v3546_v37  ;;  %v858_v15 = vadd.f32 %v3546_v37, %v857_v44  ;;  %v1229_v46 = vrot.slane %v1228_v43, 4  ;;  %v1607_v49 = vrot.slane %v1606_v63, 4  ;;  %v1531_v44 = vpop.permute.xlu0 %1530 }
 0x1f6   : > { %v1220_v50 = vrot.slane %v1219_v31, 4  ;;  %v1598_v53 = vrot.slane %v1597_v45, 4  ;;  %v1653_v27 = vsel %vm1652_vm11, %v3640_v1, %v3597_v12  ;;  %v1823_v11 = vsel %vm1652_vm11, %v3642_v47, %v3602_v17 }
 0x1f7   : > { %v3654_v52 = vmul.f32 %v3642_v47, %v3640_v1  ;;  %v2153_v61 = vsub.f32 %v3640_v1, %v3642_v47  ;;  %v1230_v13 = vmax.f32 %v1228_v43, %v1229_v46  ;;  %v1608_v55 = vmax.f32 %v1606_v63, %v1607_v49 }
 0x1f8   : > { %v1221_v14 = vmax.f32 %v1219_v31, %v1220_v50  ;;  %v1599_v26 = vmax.f32 %v1597_v45, %v1598_v53  ;;  %v1179_v12 = vadd.f32 %v3453_v36, %v866_v48  ;;  %v1557_v32 = vadd.f32 %v1536_v54, %v866_v48 }
 0x1f9   : > { %v1177_v56 = vadd.f32 %v3449_v34, %v858_v15  ;;  %v1555_v17 = vadd.f32 %v1526_v33, %v858_v15  ;;  %v1231_v57 = vrot.slane %v1230_v13, 2  ;;  %v1609_v30 = vrot.slane %v1608_v55, 2  ;;  %v1541_v42 = vpop.permute.xlu0 %1540 }
 0x1fa   : > { %v1222_v16 = vrot.slane %v1221_v14, 2  ;;  %v1600_v59 = vrot.slane %v1599_v26, 2  ;;  %v1244_v6 = vsel %vm582_vm0, %v1179_v12, -inf  ;;  %v1622_v18 = vsel %vm582_vm0, %v1557_v32, -inf }
 0x1fb   : > { %v1235_v8 = vsel %vm582_vm0, %v1177_v56, -inf  ;;  %v1613_v10 = vsel %vm582_vm0, %v1555_v17, -inf  ;;  %v1232_v38 = vmax.f32 %v1230_v13, %v1231_v57  ;;  %v1610_v40 = vmax.f32 %v1608_v55, %v1609_v30 }
 0x1fc   : > { %v1223_v36 = vmax.f32 %v1221_v14, %v1222_v16  ;;  %v1601_v39 = vmax.f32 %v1599_v26, %v1600_v59  ;;  %v869_v34 = vadd.f32 %v3614_v4, %v3546_v37  ;;  %v861_v33 = vadd.f32 %v3546_v37, %v3618_v51 }
 0x1fd   : > { %v1655_v41 = vsel %vm1654_vm12, %v3626_v29, %v1653_v27  ;;  %v1824_v22 = vsel %vm1654_vm12, %v3628_v58, %v1823_v11  ;;  %v1233_v43 = vrot.slane %v1232_v38, 1  ;;  %v1611_v63 = vrot.slane %v1610_v40, 1 }
 0x1fe   : > { %v1224_v31 = vrot.slane %v1223_v36, 1  ;;  %v1602_v45 = vrot.slane %v1601_v39, 1  ;;  %v1180_v48 = vadd.f32 %v3451_v35, %v869_v34  ;;  %v1558_v15 = vadd.f32 %v1541_v42, %v869_v34 }
 0x1ff   : > { %v1178_v46 = vadd.f32 %v3447_v28, %v861_v33  ;;  %v1556_v4 = vadd.f32 %v1531_v44, %v861_v33  ;;  %v1234_v49 = vmax.f32 %v1232_v38, %v1233_v43  ;;  %v1612_v50 = vmax.f32 %v1610_v40, %v1611_v63 }
 0x200   : > { %v1225_v37 = vmax.f32 %v1223_v36, %v1224_v31  ;;  %v1603_v51 = vmax.f32 %v1601_v39, %v1602_v45  ;;  %v1245_v53 = vsel %vm582_vm0, %v1180_v48, -inf  ;;  %v1623_v27 = vsel %vm582_vm0, %v1558_v15, -inf }
 0x201   : > { %v1236_v11 = vsel %vm582_vm0, %v1178_v46, -inf  ;;  %v1614_v54 = vsel %vm582_vm0, %v1556_v4, -inf  ;;  %v1246_v14 = vmax.f32 %v1244_v6, %v1245_v53  ;;  %v1624_v35 = vmax.f32 %v1622_v18, %v1623_v27 }
 0x202   : > { %v2055_v13 = vmul.f32 %v1603_v51, %v1225_v37  ;;  %v2155_v55 = vsub.f32 %v1225_v37, %v1603_v51  ;;  %v1237_v26 = vmax.f32 %v1235_v8, %v1236_v11  ;;  %v1615_v12 = vmax.f32 %v1613_v10, %v1614_v54  ;;  %v1903_v11 = vld [vmem:[%s3890_s10] sm:$0xff]  ;;  %v1904_v54 = vld [vmem:[%s3890_s10 + $0x8] sm:$0xff] }
 0x203   : > { %v1657_v28 = vsel %vm1656_vm13, %v1225_v37, %v1655_v41  ;;  %v1825_v44 = vsel %vm1656_vm13, %v1603_v51, %v1824_v22  ;;  %v1247_v32 = vrot.slane %v1246_v14, 4  ;;  %v1625_v56 = vrot.slane %v1624_v35, 4 }
 0x204   : > { %v1659_v17 = vsel %vm1658_vm14, %v1234_v49, %v1657_v28  ;;  %v1826_v57 = vsel %vm1658_vm14, %v1612_v50, %v1825_v44  ;;  %v1238_v30 = vrot.slane %v1237_v26, 4  ;;  %v1616_v16 = vrot.slane %v1615_v12, 4  ;;  %v2162_v28 = vld [vmem:[%s3890_s10 + $0x78] sm:$0xff] }
 0x205   : > { %v2156_v59 = vsub.f32 %v1234_v49, %v1612_v50  ;;  %v2171_v6 = vsel %vm1650_vm10, %v2152_v7, %v2151_v9  ;;  %v1248_v18 = vmax.f32 %v1246_v14, %v1247_v32  ;;  %v1626_v8 = vmax.f32 %v1624_v35, %v1625_v56  ;;  %v2160_v35 = vld [vmem:[%s3890_s10 + $0x68] sm:$0xff]  ;;  %v2572_v32 = vld [vmem:[%s3889_s9] ss:$0 sm:$0xff] }
 0x206   : > { %v2172_v10 = vsel %vm1652_vm11, %v2153_v61, %v2171_v6  ;;  %v2056_v38 = vmul.f32 %v1612_v50, %v1234_v49  ;;  %v1239_v40 = vmax.f32 %v1237_v26, %v1238_v30  ;;  %v1617_v36 = vmax.f32 %v1615_v12, %v1616_v16  ;;  %v2161_v12 = vld [vmem:[%s3890_s10 + $0x70] sm:$0xff]  ;;  %v1907_v16 = vld [vmem:[%s3890_s10 + $0x20] sm:$0xff] }
 0x207   : > { %v2173_v62 = vsel %vm1654_vm12, %v2154_v25, %v2172_v10  ;;  %v2071_v24 = vsel %vm1650_vm10, %v3590_v0, %v3606_v21  ;;  %v1249_v60 = vrot.slane %v1248_v18, 2  ;;  %v1627_v23 = vrot.slane %v1626_v8, 2  ;;  %v1910_v10 = vld [vmem:[%s3890_s10 + $0x38] sm:$0xff] }
 0x208   : > { %v2174_v7 = vsel %vm1656_vm13, %v2155_v55, %v2173_v62  ;;  %v2072_v9 = vsel %vm1652_vm11, %v3654_v52, %v2071_v24  ;;  %v1240_v1 = vrot.slane %v1239_v40, 2  ;;  %v1618_v47 = vrot.slane %v1617_v36, 2  ;;  %v1906_v55 = vld [vmem:[%s3890_s10 + $0x18] sm:$0xff]  ;;  %v2059_v62 = vld [vmem:[%s3890_s10 + $0x40] sm:$0xff]  ;;  %v2060_v24 = vld [vmem:[%s3890_s10 + $0x48] sm:$0xff] }
 0x209   : > { %v2175_v61 = vsel %vm1658_vm14, %v2156_v59, %v2174_v7  ;;  %v2073_v29 = vsel %vm1654_vm12, %v3636_v20, %v2072_v9  ;;  %v1250_v58 = vmax.f32 %v1248_v18, %v1249_v60  ;;  %v1628_v25 = vmax.f32 %v1626_v8, %v1627_v23  ;;  %v1908_v59 = vld [vmem:[%s3890_s10 + $0x28] sm:$0xff]  ;;  %v1909_v8 = vld [vmem:[%s3890_s10 + $0x30] sm:$0xff]  ;;  %v2062_v9 = vld [vmem:[%s3890_s10 + $0x58] sm:$0xff] }
 0x20a   : > { %v2074_v39 = vsel %vm1656_vm13, %v2055_v13, %v2073_v29  ;;  %v1241_v34 = vmax.f32 %v1239_v40, %v1240_v1  ;;  %v1619_v0 = vmax.f32 %v1617_v36, %v1618_v47  ;;  %v2816_v13 = vpack.c.bf16 %v1904_v54, %v1903_v11  ;;  %v2061_v7 = vld [vmem:[%s3890_s10 + $0x50] sm:$0xff]  ;;  %v2251_v29 = vld [vmem:[%s3890_s10 + $0x80] sm:$0xff] }
 0x20b   : > { %v2075_v21 = vsel %vm1658_vm14, %v2056_v38, %v2074_v39  ;;  %v1251_v33 = vrot.slane %v1250_v58, 1  ;;  %v1629_v41 = vrot.slane %v1628_v25, 1  ;;  %v2831_v44 = vpack.c.bf16 %v2162_v28, %v2161_v12  ;;  %v2582_v11 = vld [vmem:[%s3893_s13] ss:$0 sm:$0xff] }
 0x20c   : > { %v1242_v22 = vrot.slane %v1241_v34, 1  ;;  %v1620_v42 = vrot.slane %v1619_v0, 1  ;;  %v2810_v18 = vpack.c.bf16 %v1908_v59, %v1907_v16  ;;  %v2813_v40 = vpack.c.bf16 %v1910_v10, %v1909_v8 }
 0x20d   : > { %v1252_v52 = vmax.f32 %v1250_v58, %v1251_v33  ;;  %v1630_v43 = vmax.f32 %v1628_v25, %v1629_v41  ;;  %v2822_v23 = vpack.c.bf16 %v2060_v24, %v2059_v62  ;;  %v2825_v1 = vpack.c.bf16 %v2062_v9, %v2061_v7  ;;  %v2252_v58 = vld [vmem:[%s3890_s10 + $0x88] sm:$0xff]  ;;  %v2253_v25 = vld [vmem:[%s3890_s10 + $0x90] sm:$0xff] }
 0x20e   : > { %v1243_v63 = vmax.f32 %v1241_v34, %v1242_v22  ;;  %v1621_v31 = vmax.f32 %v1619_v0, %v1620_v42  ;;  %v2834_v39 = vpack.c.bf16 %v2252_v58, %v2251_v29  ;;  %v2254_v34 = vld [vmem:[%s3890_s10 + $0x98] sm:$0xff] }
 0x20f   : > { %v2158_v45 = vsub.f32 %v1252_v52, %v1630_v43  ;;  %v2058_v20 = vmul.f32 %v1630_v43, %v1252_v52  ;;  %v2837_v0 = vpack.c.bf16 %v2254_v34, %v2253_v25 }
 0x210   : > { %v1661_v48 = vsel %vm1660_vm15, %v1243_v63, %v1659_v17  ;;  %v1827_v15 = vsel %vm1660_vm15, %v1621_v31, %v1826_v57  ;;  %v2157_v46 = vsub.f32 %v1243_v63, %v1621_v31  ;;  %v2057_v4 = vmul.f32 %v1621_v31, %v1243_v63 }
 0x211   : > { %v1663_v49 = vsel %vm1662_vm1, %v1252_v52, %v1661_v48  ;;  %v3708_v50 = vsel %vm1662_vm1, %v1630_v43, %v1827_v15 }
 0x212   : > { %2701 = vmatmul.mubr.msk.f32.vlgmr.msra.gmra.mrb[16].mxu0 %vm582_vm0, %v1663_v49  ;;  %v2176_v37 = vsel %vm1660_vm15, %v2157_v46, %v2175_v61  ;;  %v2076_v51 = vsel %vm1660_vm15, %v2057_v4, %v2075_v21  ;;  %v2338_v21 = vld [vmem:[%s3892_s12 + $0x8] sm:$0xff]  ;;  %v2340_v4 = vld [vmem:[%s3892_s12 + $0x18] sm:$0xff] }
 0x213   : > { %2805 = vmatpush3.bf16.msra.mxu0 %v3510_v19  ;;  %2722 = vmatprep.mubr.msk.f32.mxu0 %vm2988_vm9, %v2989_v5  ;;  %v2177_v53 = vsel %vm1662_vm1, %v2158_v45, %v2176_v37  ;;  %v3714_v27 = vsel %vm1662_vm1, %v2058_v20, %v2076_v51  ;;  %v1905_v19 = vld [vmem:[%s3890_s10 + $0x10] sm:$0xff]  ;;  %v2581_v37 = vld [vmem:[%s3891_s11] ss:$0 sm:$0xff] }
 0x214   : > { %2806 = vmatprep.subr.bf16.mxu0 %v2987_v3  ;;  %v2819_v14 = vpack.c.bf16 %v1906_v55, %v1905_v19 }
 0x217   : > { %2808 = vmatpush3.bf16.msra.mxu0 %v3521_v2  ;;  %v2159_v2 = vld [vmem:[%s3890_s10 + $0x60] sm:$0xff] }
 0x218   : > { %2815 = vmatprep.subr.bf16.mxu0 %v2987_v3  ;;  %v2828_v26 = vpack.c.bf16 %v2160_v35, %v2159_v2 }
 0x21a   : > { %2723 = vmatmul.mubr.msk.f32.vlgmr.msra.gmra.mrb[18].mxu0 %vm582_vm0, %v3708_v50 }
 0x21b   : > { %2817 = vmatpush3.bf16.msra.mxu0 %v2816_v13  ;;  %2744 = vmatprep.mubr.msk.f32.mxu0 %vm2988_vm9, %v2989_v5 }
 0x21c   : > { %2818 = vmatprep.subr.bf16.mxu0 %v2987_v3 }
 0x21f   : > { %2820 = vmatpush3.bf16.msra.mxu0 %v2819_v14 }
 0x220   : > { %2827 = vmatprep.subr.bf16.mxu0 %v2987_v3 }
 0x222   : > { %2745 = vmatmul.mubr.msk.f32.vlgmr.msra.gmra.mrb[20].mxu0 %vm582_vm0, %v1663_v49 }
 0x223   : > { %2829 = vmatpush3.bf16.msra.mxu0 %v2828_v26  ;;  %2766 = vmatprep.mubr.msk.f32.mxu0 %vm2988_vm9, %v2989_v5 }
 0x224   : > { %2830 = vmatprep.subr.bf16.mxu0 %v2987_v3 }
 0x227   : > { %2832 = vmatpush3.bf16.msra.mxu0 %v2831_v44 }
 0x228   : > { %2839 = vmatprep.subr.bf16.mxu0 %v2987_v3 }
 0x22a   : > { %2767 = vmatmul.mubr.msk.f32.vlgmr.msra.gmra.mrb[22].mxu0 %vm582_vm0, %v2177_v53 }
 0x22b   : > { %2788 = vmatprep.mubr.msk.f32.mxu0 %vm2988_vm9, %v2989_v5 }
 0x2e5   : > { %v1732_v56 = vpop.f32.mrb[16].mxu0 }
 0x2e6   : > { %v1733_v17 = vadd.f32 %v2572_v32, %v1732_v56  ;;  %v2702_v57 = vpop.f32.mrb[17].mxu0 }
 0x2e8   : > { %2909 = vtanh.f32 %v1733_v17 }
 0x2ed   : > { %v1897_v30 = vpop.f32.mrb[18].mxu0 }
 0x2ee   : > { %v2724_v6 = vpop.f32.mrb[19].mxu0 }
 0x2f2   : > { %v2910_v38 = vpop.eup %2909 }
 0x2f3   : > { %2712 = vmatmul.mubr.msk.f32.vlgmr.msra.gmra.mrb[16].mxu1 %vm582_vm0, %v2910_v38 }
 0x2f4   : > { %2811 = vmatpush3.bf16.msra.mxu1 %v2810_v18  ;;  %2733 = vmatprep.mubr.msk.f32.mxu1 %vm2988_vm9, %v2989_v5 }
 0x2f5   : > { %v2047_v36 = vpop.f32.mrb[20].mxu0  ;;  %2812 = vmatprep.subr.bf16.mxu1 %v2987_v3 }
 0x2f6   : > { %v2746_v60 = vpop.f32.mrb[21].mxu0 }
 0x2f8   : > { %2814 = vmatpush3.bf16.msra.mxu1 %v2813_v40 }
 0x2f9   : > { %2821 = vmatprep.subr.bf16.mxu1 %v2987_v3 }
 0x2fb   : > { %2734 = vmatmul.mubr.msk.f32.vlgmr.msra.gmra.mrb[18].mxu1 %vm582_vm0, %v3708_v50 }
 0x2fc   : > { %2823 = vmatpush3.bf16.msra.mxu1 %v2822_v23  ;;  %2755 = vmatprep.mubr.msk.f32.mxu1 %vm2988_vm9, %v2989_v5 }
 0x2fd   : > { %v2246_v47 = vpop.f32.mrb[22].mxu0  ;;  %2824 = vmatprep.subr.bf16.mxu1 %v2987_v3 }
 0x2fe   : > { %v2768_v61 = vpop.f32.mrb[23].mxu0 }
 0x300   : > { %2826 = vmatpush3.bf16.msra.mxu1 %v2825_v1 }
 0x301   : > { %2833 = vmatprep.subr.bf16.mxu1 %v2987_v3 }
 0x303   : > { %2756 = vmatmul.mubr.msk.f32.vlgmr.msra.gmra.mrb[20].mxu1 %vm582_vm0, %v3714_v27 }
 0x304   : > { %2777 = vmatprep.mubr.msk.f32.mxu1 %vm2988_vm9, %v2989_v5  ;;  %2835 = vmatpush3.bf16.msra.mxu1 %v2834_v39  ;;  %v2337_v5 = vld [vmem:[%s3892_s12] sm:$0xff] }
 0x305   : > { %2836 = vmatprep.subr.bf16.mxu1 %v2987_v3  ;;  %v2840_v33 = vpack.c.bf16 %v2338_v21, %v2337_v5 }
 0x307   : > { %2841 = vmatpush3.bf16.msra.mxu0 %v2840_v33 }
 0x308   : > { %2838 = vmatpush3.bf16.msra.mxu1 %v2837_v0  ;;  %2842 = vmatprep.subr.bf16.mxu0 %v2987_v3  ;;  %v2339_v3 = vld [vmem:[%s3892_s12 + $0x10] sm:$0xff] }
 0x309   : > { %v2843_v49 = vpack.c.bf16 %v2340_v4, %v2339_v3 }
 0x30b   : > { %2844 = vmatpush3.bf16.msra.mxu0 %v2843_v49 }
 0x3c6   : > { %v1810_v41 = vpop.f32.mrb[16].mxu1 }
 0x3c7   : > { %v1898_v22 = vadd.f32 %v1897_v30, %v1810_v41  ;;  %v2713_v42 = vpop.f32.mrb[17].mxu1 }
 0x3c9   : > { %v1901_v52 = vadd.f32 %v2572_v32, %v1898_v22 }
 0x3cb   : > { %2911 = vtanh.f32 %v1901_v52 }
 0x3ce   : > { %v1977_v43 = vpop.f32.mrb[18].mxu1 }
 0x3cf   : > { %v2048_v63 = vadd.f32 %v2047_v36, %v1977_v43  ;;  %v2735_v31 = vpop.f32.mrb[19].mxu1 }
 0x3d5   : > { %v2912_v45 = vpop.eup %2911 }
 0x3d6   : > { %v2146_v20 = vpop.f32.mrb[20].mxu1  ;;  %2778 = vmatmul.mubr.msk.f32.vlgmr.msra.gmra.mrb[22].mxu1 %vm582_vm0, %v2912_v45 }
 0x3d7   : > { %v2150_v48 = vadd.f32 %v2146_v20, %v2048_v63  ;;  %v2757_v15 = vpop.f32.mrb[21].mxu1 }
 0x3d9   : > { %v2250_v46 = vadd.f32 %v2246_v47, %v2150_v48 }
 0x4a9   : > { %v2324_v50 = vpop.f32.mrb[22].mxu1 }
 0x4aa   : > { %v2328_v51 = vadd.f32 %v2324_v50, %v2250_v46  ;;  %v2779_v53 = vpop.f32.mrb[23].mxu1 }
 0x4ac   : > { %v2336_v27 = vadd.f32 %v2581_v37, %v2328_v51 }
 0x4ae   : > { %2789 = vmatmul.mubr.msk.f32.vlgmr.msra.gmra.mrb[24].mxu0 %vm582_vm0, %v2336_v27 }
 0x581   : > { %v2417_v54 = vpop.f32.mrb[24].mxu0 }
 0x582   : > { %v2418_v13 = vadd.f32 %v2582_v11, %v2417_v54  ;;  %v2790_v19 = vpop.f32.mrb[25].mxu0 }
 0x584   : > { %2433 = vst [vmem:[%s487_s20] sm:$0xff] %v2418_v13  ;;  %2421 = vmax.xlane.f32.xlu1 %v2418_v13 }
 0x611   : > { %v2422_v55 = vpop.xlane.xlu1 %2421 }
 0x612   : > { %v2423_v14 = vsub.f32 %v2418_v13, %v2422_v55 }
 0x614   : > { %v2424_v2 = vmul.f32 1.442695, %v2423_v14 }
 0x616   : > { %2913 = vpow2.f32 %v2424_v2 }
 0x620   : > { %v2914_v35 = vpop.eup %2913 }
 0x621   : > { %2426 = vadd.xlane.f32.xlu0 %v2914_v35 }
 0x6ae   : > { %v2427_v26 = vpop.xlane.xlu0 %2426 }
 0x6af   : > { %2915 = vrcp.f32 %v2427_v26 }
 0x6b0   : > { %2917 = vlog2.f32 %v2427_v26 }
 0x6b9   : > { %v2916_v12 = vpop.eup %2915 }
 0x6ba   : > { %v2918_v28 = vpop.eup %2917  ;;  %v2429_v44 = vmul.f32 %v2916_v12, %v2914_v35 }
 0x6bb   : > { %v2431_v32 = vmul.f32 0.6931472, %v2918_v28 }
 0x6bc   : > { %2434 = vst [vmem:[%s487_s20 + $0x8] sm:$0xff] %v2429_v44 }
 0x6bd   : > { %v2432_v56 = vsub.f32 %v2423_v14, %v2431_v32 }
 0x6bf   : > { %2435 = vst [vmem:[%s487_s20 + $0x10] sm:$0xff] %v2432_v56 }
 0x6c0   : > { %2932 = shalt.err (!%p2929_p4)
}
 0x6c1   : > { %s2933_s3 = scalar_lea.hbm %s3838_s18, 384  ;;  %s2937_s26 = scalar_lea.hbm %s3894_s14, 768 }
 0x6c2   : > { %p2934_p7 = scmp.ne.s32.totalorder %s3838_s18, %s2933_s3  ;;  %p2938_p10 = scmp.lt.u32.totalorder %s3838_s18, %s3894_s14 }
 0x6c3   : > { %p2939_p11 = scmp.lt.u32.totalorder %s2937_s26, %s2933_s3  ;;  %p2941_p13 = scmp.lt.u32.totalorder %s2933_s3, %s3838_s18 }
 0x6c4   : > { %p2935_p8 = pnand %p2934_p7, %p3104_p5 }
 0x6c5   : > { %p2940_p12 = por %p2939_p11, %p2938_p10 }
 0x6c6   : > { %p2936_p9 = pneg %p2935_p8 }
 0x6c7   : > { %p2942_p0 = por %p2941_p13, %p2940_p12 }
 0x6c9   : > { %p2943_p1 = pnand %p2942_p0, %p2936_p9 }
 0x6cb   : > { %2946 = shalt.err (!%p2943_p1)
}
 0x6cc   : > { %2847 = dma.vmem_to_hbm [thread:$0]  (%p3104_p5), %s3840_s25, 384, %s3838_s18, %s2437_s15  }
 0x6cd PF: > { %p2853_p2 = scmp.ge.s32.totalorder %s2981_s16, 2  ;;  %s2463_s0 = sand.u32 1, %s2969_s29  }
 0x6ce   : > { %s2464_s22 = scalar_lea.sflag [#allocation3], %s2463_s0 }
 0x6cf   : > { %p2850_p3 = pnand %p2853_p2, %p3108_p6 }
 0x6d1   : > { %2964 = dma.done.wait (!%p2850_p3), %s2464_s22, 384  }
 0x6d2   : > { %2966 = vsyncadd (!%p2850_p3), %s2464_s22, 4294966912  ;;  %s3904_s27 = sld [smem:[#allocation5_spill]]  ;;  %s3905_s15 = sld [smem:[#allocation6_spill]] }
 0x6d3   : > { %p24_p4 = scmp.ge.s32.totalorder %s3091_s19, 4   ;;  %s3906_s29 = smov %s2973_s30 }
 0x6d4   : > { %s3908_s16 = smov %s3091_s19 }
 0x6d5   :  { %26 = sbr.rel (!%p24_p4) target bundleno = 6 (0x6), region = 117 }
 0x6d8   : > { %s3907_s30 = smov %s3904_s27 }
 0x6dc   :  { %2469 = vsyncpa [#allocation3], 1 }
 0x6dd   :  { %2471 = vsyncpa [#allocation3 + $0x1], 1 }

</bundles_post_ra>
